<compile_context>
chip_gen: v5e
topology: v5e:2x2
jax: 0.10.0
libtpu: 0.0.40
codegen_flags: <defaults>
</compile_context>

<pallas_src>
import numpy as np

import jax
import jax.numpy as jnp
from jax.experimental import pallas as pl
from jax.experimental.pallas import tpu as pltpu

# ------------------------- model hyper-parameters (small) -------------------------
EMBED_NUM = 32            # vocab size V
EMBED_DIM = 32            # D
NUM_CLASSES = 5
KERNEL_NUMS = (3, 4, 5)   # out_channels per conv branch
KERNEL_SIZES = (3, 4, 5)  # temporal kernel widths
BATCH = 2
SEQ_LEN = 16

TB = 8                    # samples per grid block (fills the 8-sublane vreg dim)
NCP = 128                 # lane-padded classifier width (lane-dense output store)


def _round_up(x, m):
    return (x + m - 1) // m * m


def cnn_text_kernel(ids_ref, emb_ref, ww_ref, pcat_ref, bconv_ref, pmask_ref,
                    fcw_ref, fcb_ref, out_ref):
    """Fused embedding + multi-width conv1d + ReLU + max-pool-over-time + linear
    for one block of TB samples.

    ids_ref   : [TB*L, 1]  int32 token ids (row-major: sample-major, time-minor)
    emb_ref   : [V, D]     embedding table
    ww_ref    : [D, KMAX*SUMC]  packed per-tap conv weights (zero for taps >= K_branch)
    pcat_ref  : [TB*L, KMAX*TB*L]  constant 0/1 tap-shift/selection operator
    bconv_ref : [1, SUMC]  packed conv biases
    pmask_ref : [TB*L, SUMC]  additive mask (0 valid / -1e30 out-of-range) for pooling
    fcw_ref   : [SUMC, NCP]  lane-padded classifier weight
    fcb_ref   : [1, NCP]     lane-padded classifier bias
    out_ref   : [TB, NCP]    lane-dense logits slab
    """
    tbl = ids_ref.shape[0]                 # TB * L token slots in this block
    V = emb_ref.shape[0]
    sumc = bconv_ref.shape[1]              # total conv channels across branches
    kmax = ww_ref.shape[1] // sumc         # max kernel width (zero-padded taps)
    tb = out_ref.shape[0]
    L = tbl // tb

    # 1) Embedding gather fused as a one-hot matmul on the MXU (table stays in VMEM).
    vocab = jax.lax.broadcasted_iota(jnp.int32, (tbl, V), 1)
    one_hot = (ids_ref[...] == vocab).astype(jnp.float32)                    # [tbl, V]
    x = jnp.dot(one_hot, emb_ref[...], preferred_element_type=jnp.float32)   # [tbl, D]

    # 2) All conv branches / taps in one matmul:
    #    y_wide[:, k*sumc + c] = x @ W_tap_k[:, c]   (zero weight for k >= K_branch(c))
    y_wide = jnp.dot(x, ww_ref[...], preferred_element_type=jnp.float32)     # [tbl, kmax*sumc]

    # 3) Tap shift-and-sum as one matmul with the constant selection operator
    #    P_cat[r, k*tbl + s] = 1  iff  s == r + k  and  (r % L) + k < L,
    #    i.e. conv[r, c] = sum_k y_k[r + k, c] restricted to within-sample taps.
    #    (Avoids sublane-misaligned shifted slices of x entirely.)
    y_stack = jnp.concatenate(
        [y_wide[:, k * sumc:(k + 1) * sumc] for k in range(kmax)], axis=0)   # [kmax*tbl, sumc]
    conv = jnp.dot(pcat_ref[...], y_stack,
                   preferred_element_type=jnp.float32)                       # [tbl, sumc]

    # 4) bias + ReLU, mask out-of-range conv positions (-1e30), max-pool over time
    #    within each sample. (Dropout is identity at inference.)
    conv = jnp.maximum(conv + bconv_ref[...], 0.0) + pmask_ref[...]
    pooled = jnp.max(conv.reshape(tb, L, sumc), axis=1)                      # [tb, sumc]

    # 5) Classifier; output is a single lane-dense [tb, 128] slab (one unmasked store).
    out_ref[...] = (jnp.dot(pooled, fcw_ref[...], preferred_element_type=jnp.float32)
                    + fcb_ref[...])


def pack_constants(params, L, tb):
    """Wrapper-side layout plumbing (pure constants, built once with numpy)."""
    D = params["embed"].shape[1]
    sumc = sum(KERNEL_NUMS)
    kmax = max(KERNEL_SIZES)
    tbl = tb * L

    # Packed per-tap conv weights / biases / per-column valid output length.
    w_wide = np.zeros((D, kmax * sumc), np.float32)
    b_packed = np.zeros((1, sumc), np.float32)
    lout = np.zeros((sumc,), np.int64)
    off = 0
    for ksz, cout in zip(KERNEL_SIZES, KERNEL_NUMS):
        w = np.asarray(params[f"w{ksz}"])          # [K, D, C]
        b = np.asarray(params[f"b{ksz}"])          # [1, C]
        for k in range(ksz):
            w_wide[:, k * sumc + off: k * sumc + off + cout] = w[k]
        b_packed[0, off:off + cout] = b[0]
        lout[off:off + cout] = L - ksz + 1
        off += cout

    # Constant 0/1 tap-shift/selection operator (conv = P_cat @ vstack_k(x @ W_k)).
    r = np.arange(tbl)
    t = r % L
    pcat = np.zeros((tbl, kmax * tbl), np.float32)
    for k in range(kmax):
        valid = t + k < L
        pcat[r[valid], k * tbl + r[valid] + k] = 1.0

    # Additive mask for out-of-range conv positions, applied after ReLU, before max.
    pool_mask = np.where(t[:, None] < lout[None, :], 0.0, -1e30).astype(np.float32)

    # Lane-padded classifier (zero pad num_classes -> NCP so the store is lane-dense).
    fcw = np.asarray(params["fcw"])                # [sumc, NC]
    fcb = np.asarray(params["fcb"])                # [1, NC]
    nc = fcw.shape[1]
    fcw_pad = np.zeros((sumc, NCP), np.float32)
    fcw_pad[:, :nc] = fcw
    fcb_pad = np.zeros((1, NCP), np.float32)
    fcb_pad[0, :nc] = fcb[0]

    consts = dict(w_wide=w_wide, b_packed=b_packed, pcat=pcat, pool_mask=pool_mask,
                  fcw_pad=fcw_pad, fcb_pad=fcb_pad)
    return {k: jnp.asarray(v) for k, v in consts.items()}


def cnn_text_forward(word_seq, params):
    """word_seq: int32 [B, L]  ->  logits float32 [B, num_classes]."""
    B, L = word_seq.shape
    emb = params["embed"].astype(jnp.float32)                    # [V, D]
    nc = params["fcb"].shape[-1]
    consts = pack_constants(params, L, TB)

    # Pad the batch up to a multiple of TB with token id 0 (valid id; rows sliced away).
    bp = _round_up(B, TB)
    ids = jnp.zeros((bp, L), jnp.int32).at[:B].set(word_seq.astype(jnp.int32))
    ids_col = ids.reshape(bp * L, 1)

    tbl = TB * L
    full = lambda a: pl.BlockSpec(a.shape, lambda i: (0, 0))     # whole-array constants

    out = pl.pallas_call(
        cnn_text_kernel,
        out_shape=jax.ShapeDtypeStruct((bp, NCP), jnp.float32),
        grid_spec=pltpu.PrefetchScalarGridSpec(
            num_scalar_prefetch=0,
            grid=(bp // TB,),                                    # one step per TB samples
            in_specs=[
                pl.BlockSpec((tbl, 1), lambda i: (i, 0)),        # token ids for this block
                full(emb),
                full(consts["w_wide"]),
                full(consts["pcat"]),
                full(consts["b_packed"]),
                full(consts["pool_mask"]),
                full(consts["fcw_pad"]),
                full(consts["fcb_pad"]),
            ],
            out_specs=pl.BlockSpec((TB, NCP), lambda i: (i, 0)),
        ),
        compiler_params=pltpu.CompilerParams(
            dimension_semantics=("parallel",)),                  # batch blocks -> both TCs (v7x)
    )(ids_col, emb, consts["w_wide"], consts["pcat"], consts["b_packed"],
      consts["pool_mask"], consts["fcw_pad"], consts["fcb_pad"])

    return out[:B, :nc]


def init_params(key):
    """Deterministic synthetic parameters (shapes from CNNText.__init__)."""
    keys = jax.random.split(key, 9)
    params = {}
    params["embed"] = 0.1 * jax.random.normal(keys[0], (EMBED_NUM, EMBED_DIM), jnp.float32)
    # Conv1d weights: PyTorch [C_out, C_in, K] stored transposed as [K, C_in, C_out]
    for i, (c_out, k) in enumerate(zip(KERNEL_NUMS, KERNEL_SIZES)):
        params[f"w{k}"] = 0.1 * jax.random.normal(keys[1 + 2 * i],
                                                  (k, EMBED_DIM, c_out), jnp.float32)
        params[f"b{k}"] = 0.1 * jax.random.normal(keys[2 + 2 * i], (1, c_out), jnp.float32)
    # Linear: PyTorch [num_classes, sum(kernel_nums)] stored transposed as [in, out]
    params["fcw"] = 0.1 * jax.random.normal(keys[7], (sum(KERNEL_NUMS), NUM_CLASSES),
                                            jnp.float32)
    params["fcb"] = 0.1 * jax.random.normal(keys[8], (1, NUM_CLASSES), jnp.float32)
    return params


def reference_forward(word_seq, params):
    """Pure-JAX reference for correctness checking (mirrors the PyTorch module)."""
    x = jnp.take(params["embed"], word_seq, axis=0)        # [B, L, D]
    feats = []
    for k in KERNEL_SIZES:
        w, b = params[f"w{k}"], params[f"b{k}"]
        L_out = x.shape[1] - k + 1
        acc = sum(jnp.einsum("bld,dc->blc", x[:, t:t + L_out, :], w[t]) for t in range(k))
        acc = jax.nn.relu(acc + b[None, :, :])
        feats.append(jnp.max(acc, axis=1))                 # [B, C]
    h = jnp.concatenate(feats, axis=-1)                    # [B, sum(C)]
    return h @ params["fcw"] + params["fcb"]               # [B, num_classes]


if __name__ == "__main__":
    key = jax.random.PRNGKey(0)
    k_param, k_data = jax.random.split(key)
    params = init_params(k_param)
    word_seq = jax.random.randint(k_data, (BATCH, SEQ_LEN), 0, EMBED_NUM, dtype=jnp.int32)

    logits = cnn_text_forward(word_seq, params)
    logits = jax.block_until_ready(logits)

    ref = reference_forward(word_seq, params)
    assert logits.shape == (BATCH, NUM_CLASSES)
    assert jnp.allclose(logits, ref, atol=1e-3, rtol=1e-3), (logits, ref)

    print("KERNEL_OK")
</pallas_src>

<mosaic_0001>
module attributes {stable_mosaic.version = 11 : i64} {
  func.func @cnn_text_kernel(%arg0: i32, %arg1: memref<128x1xi32, #tpu.memory_space<vmem>>, %arg2: memref<32x32xf32, #tpu.memory_space<vmem>>, %arg3: memref<32x60xf32, #tpu.memory_space<vmem>>, %arg4: memref<128x640xf32, #tpu.memory_space<vmem>>, %arg5: memref<1x12xf32, #tpu.memory_space<vmem>>, %arg6: memref<128x12xf32, #tpu.memory_space<vmem>>, %arg7: memref<12x128xf32, #tpu.memory_space<vmem>>, %arg8: memref<1x128xf32, #tpu.memory_space<vmem>>, %arg9: memref<8x128xf32, #tpu.memory_space<vmem>>) attributes {dimension_semantics = [#tpu.dimension_semantics<parallel>], iteration_bounds = array<i64: 1>, scalar_prefetch = 0 : i64, scratch_operands = 0 : i64, tpu.core_type = #tpu.core_type<tc>, window_params = [{transform_indices = @transform_0, window_bounds = array<i64: 128, 1>}, {pipeline_mode = #tpu.pipeline_mode<synchronous>, transform_indices = @transform_1, window_bounds = array<i64: 32, 32>}, {pipeline_mode = #tpu.pipeline_mode<synchronous>, transform_indices = @transform_2, window_bounds = array<i64: 32, 60>}, {pipeline_mode = #tpu.pipeline_mode<synchronous>, transform_indices = @transform_3, window_bounds = array<i64: 128, 640>}, {pipeline_mode = #tpu.pipeline_mode<synchronous>, transform_indices = @transform_4, window_bounds = array<i64: 1, 12>}, {pipeline_mode = #tpu.pipeline_mode<synchronous>, transform_indices = @transform_5, window_bounds = array<i64: 128, 12>}, {pipeline_mode = #tpu.pipeline_mode<synchronous>, transform_indices = @transform_6, window_bounds = array<i64: 12, 128>}, {pipeline_mode = #tpu.pipeline_mode<synchronous>, transform_indices = @transform_7, window_bounds = array<i64: 1, 128>}, {transform_indices = @transform_8, window_bounds = array<i64: 8, 128>}]} {
    %0 = tpu.iota {dimensions = array<i32: 1>} : vector<128x32xi32>
    %c0 = arith.constant 0 : index
    %c0_0 = arith.constant 0 : index
    %1 = vector.load %arg1[%c0, %c0_0] : memref<128x1xi32, #tpu.memory_space<vmem>>, vector<128x1xi32>
    %2 = vector.broadcast %1 : vector<128x1xi32> to vector<128x32xi32>
    %3 = arith.cmpi eq, %2, %0 : vector<128x32xi32>
    %4 = arith.extui %3 : vector<128x32xi1> to vector<128x32xi32>
    %5 = arith.sitofp %4 : vector<128x32xi32> to vector<128x32xf32>
    %c0_1 = arith.constant 0 : index
    %c0_2 = arith.constant 0 : index
    %6 = vector.load %arg2[%c0_1, %c0_2] : memref<32x32xf32, #tpu.memory_space<vmem>>, vector<32x32xf32>
    %cst = arith.constant dense<0.000000e+00> : vector<128x32xf32>
    %7 = tpu.matmul %5, %6, %cst {dimension_numbers = #tpu.dot_dimension_numbers<[1], [0], [0], [1], [0, 0, 1, 1], [], []>} : vector<128x32xf32>, vector<32x32xf32>, vector<128x32xf32> -> vector<128x32xf32>
    %c0_3 = arith.constant 0 : index
    %c0_4 = arith.constant 0 : index
    %8 = vector.load %arg3[%c0_3, %c0_4] : memref<32x60xf32, #tpu.memory_space<vmem>>, vector<32x60xf32>
    %cst_5 = arith.constant dense<0.000000e+00> : vector<128x60xf32>
    %9 = tpu.matmul %7, %8, %cst_5 {dimension_numbers = #tpu.dot_dimension_numbers<[1], [0], [0], [1], [0, 0, 1, 1], [], []>} : vector<128x32xf32>, vector<32x60xf32>, vector<128x60xf32> -> vector<128x60xf32>
    %10 = vector.extract_strided_slice %9 {offsets = [0, 0], sizes = [128, 12], strides = [1, 1]} : vector<128x60xf32> to vector<128x12xf32>
    %11 = vector.extract_strided_slice %9 {offsets = [0, 12], sizes = [128, 12], strides = [1, 1]} : vector<128x60xf32> to vector<128x12xf32>
    %12 = vector.extract_strided_slice %9 {offsets = [0, 24], sizes = [128, 12], strides = [1, 1]} : vector<128x60xf32> to vector<128x12xf32>
    %13 = vector.extract_strided_slice %9 {offsets = [0, 36], sizes = [128, 12], strides = [1, 1]} : vector<128x60xf32> to vector<128x12xf32>
    %14 = vector.extract_strided_slice %9 {offsets = [0, 48], sizes = [128, 12], strides = [1, 1]} : vector<128x60xf32> to vector<128x12xf32>
    %15 = tpu.concatenate %10, %11, %12, %13, %14 in 0 : vector<128x12xf32>, vector<128x12xf32>, vector<128x12xf32>, vector<128x12xf32>, vector<128x12xf32> -> vector<640x12xf32>
    %c0_6 = arith.constant 0 : index
    %c0_7 = arith.constant 0 : index
    %16 = vector.load %arg4[%c0_6, %c0_7] : memref<128x640xf32, #tpu.memory_space<vmem>>, vector<128x640xf32>
    %cst_8 = arith.constant dense<0.000000e+00> : vector<128x12xf32>
    %17 = tpu.matmul %16, %15, %cst_8 {dimension_numbers = #tpu.dot_dimension_numbers<[1], [0], [0], [1], [0, 0, 1, 1], [], []>} : vector<128x640xf32>, vector<640x12xf32>, vector<128x12xf32> -> vector<128x12xf32>
    %c0_9 = arith.constant 0 : index
    %c0_10 = arith.constant 0 : index
    %18 = vector.load %arg5[%c0_9, %c0_10] : memref<1x12xf32, #tpu.memory_space<vmem>>, vector<1x12xf32>
    %19 = vector.broadcast %18 : vector<1x12xf32> to vector<128x12xf32>
    %20 = arith.addf %17, %19 : vector<128x12xf32>
    %cst_11 = arith.constant 0.000000e+00 : f32
    %21 = vector.broadcast %cst_11 : f32 to vector<128x12xf32>
    %22 = arith.maximumf %20, %21 : vector<128x12xf32>
    %c0_12 = arith.constant 0 : index
    %c0_13 = arith.constant 0 : index
    %23 = vector.load %arg6[%c0_12, %c0_13] : memref<128x12xf32, #tpu.memory_space<vmem>>, vector<128x12xf32>
    %24 = arith.addf %22, %23 : vector<128x12xf32>
    %25 = vector.shape_cast %24 : vector<128x12xf32> to vector<8x16x12xf32>
    %cst_14 = arith.constant dense<0xFF800000> : vector<8x12xf32>
    %26 = vector.multi_reduction <maximumf>, %25, %cst_14 [1] : vector<8x16x12xf32> to vector<8x12xf32>
    %c0_15 = arith.constant 0 : index
    %c0_16 = arith.constant 0 : index
    %27 = vector.load %arg7[%c0_15, %c0_16] : memref<12x128xf32, #tpu.memory_space<vmem>>, vector<12x128xf32>
    %cst_17 = arith.constant dense<0.000000e+00> : vector<8x128xf32>
    %28 = tpu.matmul %26, %27, %cst_17 {dimension_numbers = #tpu.dot_dimension_numbers<[1], [0], [0], [1], [0, 0, 1, 1], [], []>} : vector<8x12xf32>, vector<12x128xf32>, vector<8x128xf32> -> vector<8x128xf32>
    %c0_18 = arith.constant 0 : index
    %c0_19 = arith.constant 0 : index
    %29 = vector.load %arg8[%c0_18, %c0_19] : memref<1x128xf32, #tpu.memory_space<vmem>>, vector<1x128xf32>
    %30 = vector.broadcast %29 : vector<1x128xf32> to vector<8x128xf32>
    %31 = arith.addf %28, %30 : vector<8x128xf32>
    %c0_20 = arith.constant 0 : index
    %c0_21 = arith.constant 0 : index
    %32 = vector.load %arg9[%c0_20, %c0_21] : memref<8x128xf32, #tpu.memory_space<vmem>>, vector<8x128xf32>
    tpu.vector_store %arg9[%c0_20, %c0_21], %31 {strides = array<i32>} : memref<8x128xf32, #tpu.memory_space<vmem>>, vector<8x128xf32>,
    return
  }
  func.func @transform_0(%arg0: i32) -> (i32, i32) {
    %c0_i32 = arith.constant 0 : i32
    %c0_i32_0 = arith.constant 0 : i32
    return %arg0, %c0_i32 : i32, i32
  }
  func.func @transform_1(%arg0: i32) -> (i32, i32) {
    %c0_i32 = arith.constant 0 : i32
    %c0_i32_0 = arith.constant 0 : i32
    %c0_i32_1 = arith.constant 0 : i32
    return %c0_i32, %c0_i32_0 : i32, i32
  }
  func.func @transform_2(%arg0: i32) -> (i32, i32) {
    %c0_i32 = arith.constant 0 : i32
    %c0_i32_0 = arith.constant 0 : i32
    %c0_i32_1 = arith.constant 0 : i32
    return %c0_i32, %c0_i32_0 : i32, i32
  }
  func.func @transform_3(%arg0: i32) -> (i32, i32) {
    %c0_i32 = arith.constant 0 : i32
    %c0_i32_0 = arith.constant 0 : i32
    %c0_i32_1 = arith.constant 0 : i32
    return %c0_i32, %c0_i32_0 : i32, i32
  }
  func.func @transform_4(%arg0: i32) -> (i32, i32) {
    %c0_i32 = arith.constant 0 : i32
    %c0_i32_0 = arith.constant 0 : i32
    %c0_i32_1 = arith.constant 0 : i32
    return %c0_i32, %c0_i32_0 : i32, i32
  }
  func.func @transform_5(%arg0: i32) -> (i32, i32) {
    %c0_i32 = arith.constant 0 : i32
    %c0_i32_0 = arith.constant 0 : i32
    %c0_i32_1 = arith.constant 0 : i32
    return %c0_i32, %c0_i32_0 : i32, i32
  }
  func.func @transform_6(%arg0: i32) -> (i32, i32) {
    %c0_i32 = arith.constant 0 : i32
    %c0_i32_0 = arith.constant 0 : i32
    %c0_i32_1 = arith.constant 0 : i32
    return %c0_i32, %c0_i32_0 : i32, i32
  }
  func.func @transform_7(%arg0: i32) -> (i32, i32) {
    %c0_i32 = arith.constant 0 : i32
    %c0_i32_0 = arith.constant 0 : i32
    %c0_i32_1 = arith.constant 0 : i32
    return %c0_i32, %c0_i32_0 : i32, i32
  }
  func.func @transform_8(%arg0: i32) -> (i32, i32) {
    %c0_i32 = arith.constant 0 : i32
    %c0_i32_0 = arith.constant 0 : i32
    return %arg0, %c0_i32 : i32, i32
  }
}

</mosaic_0001>

<bundles_post_ra>
// kernel: tpu_custom_call.1
= control target key start
LH: loop header
LB: loop body
LE: loop exit
PB: predicated region body
PF: predicated region fallthrough
CT: control target
= control target key end

     0   :  { %13 = vsyncpa [#allocation3], 0  ;;  %s2097_s0 = inlined_call_operand.vmem [shape: s32[128,1], index: 0, kind: input, shape index: {}]   ;;  %s2098_s1 = inlined_call_operand.vmem [shape: f32[32,32], index: 1, kind: input, shape index: {}]   ;;  %s2099_s2 = inlined_call_operand.vmem [shape: f32[32,60], index: 2, kind: input, shape index: {}]   ;;  %s2100_s3 = inlined_call_operand.hbm [shape: f32[128,640], index: 3, kind: input, shape index: {}]   ;;  %s2101_s4 = inlined_call_operand.vmem [shape: f32[1,12], index: 4, kind: input, shape index: {}]   ;;  %s2102_s5 = inlined_call_operand.vmem [shape: f32[128,12], index: 5, kind: input, shape index: {}]   ;;  %s2103_s6 = inlined_call_operand.vmem [shape: f32[12,128], index: 6, kind: input, shape index: {}]   ;;  %s2104_s7 = inlined_call_operand.vmem [shape: f32[1,128], index: 7, kind: input, shape index: {}]   ;;  %s2105_s8 = inlined_call_operand.hbm [shape: f32[8,128], index: 8, kind: output, shape index: {}]  }
   0x1   :  { %14 = vsyncpa [#allocation4], 0  ;;  %s25_s29 = sshll.u32 %s2100_s3, 4  ;;  %s1530_s30 = smov [#allocation2]   ;;  %s26_s29 = int_to_ptr.hbm [resolvable:$true] %s25_s29 }
   0x2   :  { %s27_s9 = sshll.u32 %s1530_s30, 4  ;;  %s1531_s10 = smov 640   ;;  %s28_s9 = int_to_ptr.vmem [resolvable:$true] %s27_s9 }
   0x3   :  { %s1532_s11 = smov 40  }
   0x4   :  { %33 = dma.hbm_to_vmem [thread:$0]  %s26_s29, 10240, %s28_s9, [#allocation3], %s1531_s10, %s1531_s10, %s1532_s11  }
   0x5   :  { %1526 = dma.done.wait [#allocation3], 10240  }
   0x6   :  { %1527 = vsyncadd [#allocation3], 4294957056  ;;  %v1533_v0 = vmov 0   ;;  %v50_v1 = vld [vmem:[%s2097_s0 + $0x10] sm:$0xff]  ;;  %v48_v2 = vld [vmem:[%s2097_s0] sm:$0xff]  ;;  %v46_v23 = vlaneseq  ;;  %v1534_v26 = vmov 0.0  }
   0x7   :  { %1314 = vset.pattern.permute.xlu1 %v1533_v0  ;;  %1313 = vset.pattern.permute.xlu0 %v1533_v0  ;;  %v52_v3 = vld [vmem:[%s2097_s0 + $0x20] sm:$0xff]  ;;  %v51_v4 = vld [vmem:[%s2097_s0 + $0x18] sm:$0xff]  ;;  %v49_v5 = vld [vmem:[%s2097_s0 + $0x8] sm:$0xff]  ;;  %vm164_vm1 = vcmask 261120   ;;  %s1536_s12 = smov 80   ;;  %s1537_s13 = smov 92  }
   0x8   :  { %1315 = vset.pattern.permute.xlu2 %v1533_v0  ;;  %71 = vperm.xlu1 %1314, %v50_v1   ;;  %v53_v6 = vld [vmem:[%s2097_s0 + $0x28] sm:$0xff]  ;;  %v163_v7 = vld [vmem:[%s2098_s1 + $0x18] sm:$0xff]  ;;  %v162_v8 = vld [vmem:[%s2098_s1 + $0x10] sm:$0xff]  ;;  %v47_v24 = vand.u32 127, %v46_v23  ;;  %s1538_s14 = smov 104   ;;  %s1539_s24 = smov [#allocation5]  }
   0x9   :  { %65 = vperm.xlu0 %1313, %v48_v2   ;;  %77 = vperm.xlu2 %1315, %v52_v3   ;;  %v161_v9 = vld [vmem:[%s2098_s1 + $0x8] sm:$0xff]  ;;  %v55_v10 = vld [vmem:[%s2097_s0 + $0x38] sm:$0xff]  ;;  %v54_v11 = vld [vmem:[%s2097_s0 + $0x30] sm:$0xff]  ;;  %s1193_s25 = sshll.u32 %s1539_s24, 4  ;;  %s1194_s25 = int_to_ptr.vmem [resolvable:$true] %s1193_s25 }
   0xa   :  { %225 = vmatpush.msra.mxu0 %v163_v7  ;;  %v56_v12 = vld [vmem:[%s2097_s0 + $0x40] sm:$0xff]  ;;  %v58_v13 = vld [vmem:[%s2097_s0 + $0x50] sm:$0xff]  ;;  %v57_v14 = vld [vmem:[%s2097_s0 + $0x48] sm:$0xff] }
   0xb   :  { %v59_v15 = vld [vmem:[%s2097_s0 + $0x58] sm:$0xff]  ;;  %v61_v16 = vld [vmem:[%s2097_s0 + $0x68] sm:$0xff]  ;;  %v60_v17 = vld [vmem:[%s2097_s0 + $0x60] sm:$0xff] }
   0xc   :  { %226 = vmatpush.msra.mxu0 %v162_v8  ;;  %v62_v18 = vld [vmem:[%s2097_s0 + $0x70] sm:$0xff]  ;;  %v63_v19 = vld [vmem:[%s2097_s0 + $0x78] sm:$0xff]  ;;  %v160_v20 = vld [vmem:[%s2098_s1] sm:$0xff]  ;;  %s1195_s0 = sshll.u32 %s2105_s8, 4  ;;  %s1196_s0 = int_to_ptr.hbm [resolvable:$true] %s1195_s0 }
   0xd   :  { %v281_v56 = vld [vmem:[%s2099_s2 + $0x18] sm:$0xff]  ;;  %v280_v57 = vld [vmem:[%s2099_s2 + $0x10] sm:$0xff]  ;;  %v279_v58 = vld [vmem:[%s2099_s2 + $0x8] sm:$0xff] }
   0xe   :  { %227 = vmatpush.msra.mxu0 %v161_v9  ;;  %342 = vmatpush.msra.mxu1 %v281_v56  ;;  %v278_v59 = vld [vmem:[%s2099_s2] sm:$0xff]  ;;  %s1535_s2 = smov 116  }
  0x10   :  { %74 = vperm.xlu1 %1314, %v51_v4   ;;  %228 = vmatpush.msra.mxu0 %v160_v20 }
  0x11   :  { %68 = vperm.xlu0 %1313, %v49_v5   ;;  %80 = vperm.xlu2 %1315, %v53_v6  }
  0x12   :  { %343 = vmatpush.msra.mxu1 %v280_v57  ;;  %v633_v57 = vld [vmem:[#allocation2 + $0xf0] sm:$0xff] }
  0x14   :  { %344 = vmatpush.msra.mxu1 %v279_v58 }
  0x16   :  { %345 = vmatpush.msra.mxu1 %v278_v59 }
  0x18   :  { %86 = vperm.xlu1 %1314, %v55_v10  }
  0x19   :  { %83 = vperm.xlu0 %1313, %v54_v11   ;;  %89 = vperm.xlu2 %1315, %v56_v12  }
  0x20   :  { %95 = vperm.xlu1 %1314, %v58_v13  }
  0x21   :  { %92 = vperm.xlu0 %1313, %v57_v14   ;;  %98 = vperm.xlu2 %1315, %v59_v15  }
  0x28   :  { %104 = vperm.xlu1 %1314, %v61_v16  }
  0x29   :  { %101 = vperm.xlu0 %1313, %v60_v17   ;;  %107 = vperm.xlu2 %1315, %v62_v18  }
  0x31   :  { %110 = vperm.xlu0 %1313, %v63_v19  }
  0x63   :  { %v78_v21 = vpop.permute.xlu2 %77 }
  0x64   :  { %vm116_vm10 = vcmp.eq.s32.totalorder %v78_v21, %v47_v24 }
  0x65   :  { %v1209_v46 = vsel %vm116_vm10, 1.0, %v1534_v26 }
  0x6b   :  { %v81_v22 = vpop.permute.xlu2 %80 }
  0x6c   :  { %vm117_vm13 = vcmp.eq.s32.totalorder %v81_v22, %v47_v24 }
  0x6d   :  { %v1210_v52 = vsel %vm117_vm13, 1.0, %v1534_v26 }
  0x73   :  { %v90_v25 = vpop.permute.xlu2 %89 }
  0x74   :  { %vm120_vm0 = vcmp.eq.s32.totalorder %v90_v25, %v47_v24 }
  0x75   :  { %v1213_v27 = vsel %vm120_vm0, 1.0, %v1534_v26 }
  0x7a   :  { %v72_v28 = vpop.permute.xlu1 %71 }
  0x7b   :  { %v66_v29 = vpop.permute.xlu0 %65  ;;  %v99_v31 = vpop.permute.xlu2 %98  ;;  %vm114_vm6 = vcmp.eq.s32.totalorder %v72_v28, %v47_v24 }
  0x7c   :  { %vm112_vm2 = vcmp.eq.s32.totalorder %v66_v29, %v47_v24  ;;  %vm123_vm3 = vcmp.eq.s32.totalorder %v99_v31, %v47_v24  ;;  %v1207_v38 = vsel %vm114_vm6, 1.0, %v1534_v26  ;;  %vm1153_vm6 = vcmask 1044484  }
  0x7d   :  { %v1205_v30 = vsel %vm112_vm2, 1.0, %v1534_v26  ;;  %v1216_v32 = vsel %vm123_vm3, 1.0, %v1534_v26  ;;  %vm1147_vm2 = vcmask 1041409   ;;  %vm1149_vm3 = vcmask 1042434  }
  0x7e   :  { %1221 = vmatmul.msk.f32.vlgmr.msra.gmra.mxu0 %vm164_vm1, %v1205_v30 }
  0x82   :  { %v75_v33 = vpop.permute.xlu1 %74 }
  0x83   :  { %v69_v34 = vpop.permute.xlu0 %68  ;;  %v108_v36 = vpop.permute.xlu2 %107  ;;  %vm115_vm7 = vcmp.eq.s32.totalorder %v75_v33, %v47_v24 }
  0x84   :  { %vm113_vm4 = vcmp.eq.s32.totalorder %v69_v34, %v47_v24  ;;  %vm126_vm5 = vcmp.eq.s32.totalorder %v108_v36, %v47_v24  ;;  %v1208_v43 = vsel %vm115_vm7, 1.0, %v1534_v26  ;;  %v603_v36 = vld [vmem:[#allocation2] sm:$0xff]  ;;  %vm1155_vm7 = vcmask 1045509  }
  0x85   :  { %v1206_v35 = vsel %vm113_vm4, 1.0, %v1534_v26  ;;  %v1219_v37 = vsel %vm126_vm5, 1.0, %v1534_v26  ;;  %vm1151_vm4 = vcmask 1043459   ;;  %vm1163_vm5 = vcmask 1043456  }
  0x86   :  { %1222 = vmatmul.msk.f32.gmra.mxu0 %vm164_vm1, %v1206_v35 }
  0x8a   :  { %v87_v39 = vpop.permute.xlu1 %86 }
  0x8b   :  { %v84_v40 = vpop.permute.xlu0 %83  ;;  %vm119_vm0 = vcmp.eq.s32.totalorder %v87_v39, %v47_v24  ;;  %v613_v39 = vld [vmem:[#allocation2 + $0x50] sm:$0xff] }
  0x8c   :  { %vm118_vm15 = vcmp.eq.s32.totalorder %v84_v40, %v47_v24  ;;  %v1212_v55 = vsel %vm119_vm0, 1.0, %v1534_v26 }
  0x8d   :  { %v1211_v54 = vsel %vm118_vm15, 1.0, %v1534_v26 }
  0x8e   :  { %1223 = vmatmul.msk.f32.gmra.mxu0 %vm164_vm1, %v1207_v38 }
  0x92   :  { %v96_v41 = vpop.permute.xlu1 %95 }
  0x93   :  { %v93_v42 = vpop.permute.xlu0 %92  ;;  %vm122_vm8 = vcmp.eq.s32.totalorder %v96_v41, %v47_v24 }
  0x94   :  { %vm121_vm9 = vcmp.eq.s32.totalorder %v93_v42, %v47_v24  ;;  %v1215_v44 = vsel %vm122_vm8, 1.0, %v1534_v26  ;;  %v658_v42 = vld [vmem:[#allocation2 + $0x1b8] sm:$0xff]  ;;  %vm1157_vm8 = vcmask 1046534  }
  0x95   :  { %v1214_v45 = vsel %vm121_vm9, 1.0, %v1534_v26  ;;  %vm1159_vm9 = vcmask 1047559  }
  0x96   :  { %1224 = vmatmul.msk.f32.gmra.mxu0 %vm164_vm1, %v1208_v43  ;;  %v618_v43 = vld [vmem:[#allocation2 + $0x78] sm:$0xff] }
  0x9a   :  { %v105_v47 = vpop.permute.xlu1 %104 }
  0x9b   :  { %v102_v48 = vpop.permute.xlu0 %101  ;;  %vm125_vm11 = vcmp.eq.s32.totalorder %v105_v47, %v47_v24  ;;  %v623_v47 = vld [vmem:[#allocation2 + $0xa0] sm:$0xff] }
  0x9c   :  { %vm124_vm12 = vcmp.eq.s32.totalorder %v102_v48, %v47_v24  ;;  %v1218_v49 = vsel %vm125_vm11, 1.0, %v1534_v26 }
  0x9d   :  { %v1217_v50 = vsel %vm124_vm12, 1.0, %v1534_v26 }
  0x9e   :  { %1225 = vmatmul.msk.f32.gmra.mxu0 %vm164_vm1, %v1209_v46  ;;  %v663_v46 = vld [vmem:[#allocation2 + $0x1e0] sm:$0xff] }
  0xa3   :  { %v111_v51 = vpop.permute.xlu0 %110 }
  0xa4   :  { %vm127_vm14 = vcmp.eq.s32.totalorder %v111_v51, %v47_v24  ;;  %v628_v51 = vld [vmem:[#allocation2 + $0xc8] sm:$0xff] }
  0xa5   :  { %v1220_v53 = vsel %vm127_vm14, 1.0, %v1534_v26 }
  0xa6   :  { %1226 = vmatmul.msk.f32.gmra.mxu0 %vm164_vm1, %v1210_v52 }
  0xae   :  { %1227 = vmatmul.msk.f32.gmra.mxu0 %vm164_vm1, %v1211_v54 }
  0xb6   :  { %1228 = vmatmul.msk.f32.gmra.mxu0 %vm164_vm1, %v1212_v55  ;;  %v673_v55 = vld [vmem:[#allocation2 + $0x230] sm:$0xff] }
  0xbe   :  { %1229 = vmatmul.msk.f32.gmra.mxu0 %vm164_vm1, %v1213_v27 }
  0xc6   :  { %1230 = vmatmul.msk.f32.gmra.mxu0 %vm164_vm1, %v1214_v45 }
  0xce   :  { %1231 = vmatmul.msk.f32.gmra.mxu0 %vm164_vm1, %v1215_v44 }
  0xd6   :  { %1232 = vmatmul.msk.f32.gmra.mxu0 %vm164_vm1, %v1216_v32 }
  0xde   :  { %1233 = vmatmul.msk.f32.gmra.mxu0 %vm164_vm1, %v1217_v50  ;;  %v668_v50 = vld [vmem:[#allocation2 + $0x208] sm:$0xff] }
  0xe6   :  { %1234 = vmatmul.msk.f32.gmra.mxu0 %vm164_vm1, %v1218_v49 }
  0xee   :  { %1235 = vmatmul.msk.f32.gmra.mxu0 %vm164_vm1, %v1219_v37  ;;  %v608_v37 = vld [vmem:[#allocation2 + $0x28] sm:$0xff] }
  0xf6   :  { %1236 = vmatmul.msk.f32.gmra.mxu0 %vm164_vm1, %v1220_v53 }
  0xfb   :  { %v230_v60 = vpop.f32.mrf.mxu0 }
  0xfc   :  { %1237 = vmatmul.msk.f32.vlgmr.msra.gmra.mxu1 %vm164_vm1, %v230_v60 }
 0x103   :  { %v233_v61 = vpop.f32.mrf.mxu0 }
 0x104   :  { %1238 = vmatmul.msk.f32.gmra.mxu1 %vm164_vm1, %v233_v61  ;;  %v678_v61 = vld [vmem:[#allocation2 + $0x258] sm:$0xff] }
 0x10b   :  { %v236_v62 = vpop.f32.mrf.mxu0 }
 0x10c   :  { %1239 = vmatmul.msk.f32.gmra.mxu1 %vm164_vm1, %v236_v62  ;;  %v638_v62 = vld [vmem:[#allocation2 + $0x118] sm:$0xff] }
 0x113   :  { %v239_v63 = vpop.f32.mrf.mxu0 }
 0x114   :  { %1240 = vmatmul.msk.f32.gmra.mxu1 %vm164_vm1, %v239_v63 }
 0x11b   :  { %v242_v0 = vpop.f32.mrf.mxu0 }
 0x11c   :  { %1241 = vmatmul.msk.f32.gmra.mxu1 %vm164_vm1, %v242_v0 }
 0x123   :  { %v245_v1 = vpop.f32.mrf.mxu0 }
 0x124   :  { %1242 = vmatmul.msk.f32.gmra.mxu1 %vm164_vm1, %v245_v1 }
 0x12b   :  { %v248_v2 = vpop.f32.mrf.mxu0 }
 0x12c   :  { %1243 = vmatmul.msk.f32.gmra.mxu1 %vm164_vm1, %v248_v2 }
 0x133   :  { %v251_v3 = vpop.f32.mrf.mxu0 }
 0x134   :  { %1244 = vmatmul.msk.f32.gmra.mxu1 %vm164_vm1, %v251_v3 }
 0x13b   :  { %v254_v4 = vpop.f32.mrf.mxu0 }
 0x13c   :  { %1245 = vmatmul.msk.f32.gmra.mxu1 %vm164_vm1, %v254_v4 }
 0x143   :  { %v257_v5 = vpop.f32.mrf.mxu0 }
 0x144   :  { %1246 = vmatmul.msk.f32.gmra.mxu1 %vm164_vm1, %v257_v5 }
 0x14b   :  { %v260_v6 = vpop.f32.mrf.mxu0 }
 0x14c   :  { %1247 = vmatmul.msk.f32.gmra.mxu1 %vm164_vm1, %v260_v6 }
 0x153   :  { %v263_v7 = vpop.f32.mrf.mxu0 }
 0x154   :  { %1248 = vmatmul.msk.f32.gmra.mxu1 %vm164_vm1, %v263_v7  ;;  %v643_v7 = vld [vmem:[#allocation2 + $0x140] sm:$0xff] }
 0x15b   :  { %v266_v8 = vpop.f32.mrf.mxu0 }
 0x15c   :  { %1249 = vmatmul.msk.f32.gmra.mxu1 %vm164_vm1, %v266_v8 }
 0x163   :  { %v269_v9 = vpop.f32.mrf.mxu0 }
 0x164   :  { %1250 = vmatmul.msk.f32.gmra.mxu1 %vm164_vm1, %v269_v9 }
 0x16b   :  { %v272_v10 = vpop.f32.mrf.mxu0 }
 0x16c   :  { %1251 = vmatmul.msk.f32.gmra.mxu1 %vm164_vm1, %v272_v10 }
 0x173   :  { %v275_v11 = vpop.f32.mrf.mxu0 }
 0x174   :  { %1252 = vmatmul.msk.f32.gmra.mxu1 %vm164_vm1, %v275_v11  ;;  %vm1060_vm1 = vcmask 97280  }
 0x179   :  { %v1692_v12 = vpop.f32.mrf.mxu1 }
 0x181   :  { %v1694_v13 = vpop.f32.mrf.mxu1 }
 0x182   :  { %v1721_v29 = vpack.i.bf16 %v1692_v12, %v1694_v13 }
 0x189   :  { %v1696_v14 = vpop.f32.mrf.mxu1 }
 0x191   :  { %v1698_v15 = vpop.f32.mrf.mxu1 }
 0x192   :  { %v1411_v35 = vpack.i.bf16 %v1696_v14, %v1698_v15 }
 0x199   :  { %v1700_v16 = vpop.f32.mrf.mxu1 }
 0x1a1   :  { %v362_v17 = vpop.f32.mrf.mxu1 }
 0x1a2   :  { %v1703_v18 = vpack.i.bf16 %v1700_v16, %v362_v17 }
 0x1a4   :  { %1317 = vrot.lane.b32.xlu0 %v1703_v18, %s1535_s2 }
 0x1a9   :  { %v365_v19 = vpop.f32.mrf.mxu1 }
 0x1b1   :  { %v368_v20 = vpop.f32.mrf.mxu1 }
 0x1b2   :  { %v1707_v21 = vpack.i.bf16 %v365_v19, %v368_v20 }
 0x1b4   :  { %1322 = vrot.lane.b32.xlu2 %v1707_v21, %s1535_s2 }
 0x1b9   :  { %v371_v22 = vpop.f32.mrf.mxu1 }
 0x1c1   :  { %v374_v23 = vpop.f32.mrf.mxu1 }
 0x1c2   :  { %v1711_v24 = vpack.i.bf16 %v371_v22, %v374_v23 }
 0x1c4   :  { %1327 = vrot.lane.b32.xlu1 %v1711_v24, %s1535_s2 }
 0x1c9   :  { %v377_v25 = vpop.f32.mrf.mxu1 }
 0x1d1   :  { %v380_v26 = vpop.f32.mrf.mxu1 }
 0x1d2   :  { %v1715_v27 = vpack.i.bf16 %v377_v25, %v380_v26 }
 0x1d4   :  { %1332 = vrot.lane.b32.xlu0 %v1715_v27, %s1535_s2 }
 0x1d9   :  { %v383_v28 = vpop.f32.mrf.mxu1 }
 0x1dc   :  { %1352 = vrot.lane.b32.xlu0 %v1721_v29, %s1535_s2 }
 0x1e1   :  { %v386_v30 = vpop.f32.mrf.mxu1 }
 0x1e2   :  { %v1336_v31 = vpack.i.bf16 %v383_v28, %v386_v30 }
 0x1e4   :  { %1377 = vrot.lane.b32.xlu0 %v1707_v21, %s1536_s12  ;;  %1337 = vrot.lane.b32.xlu2 %v1336_v31, %s1535_s2 }
 0x1e9   :  { %v389_v32 = vpop.f32.mrf.mxu1 }
 0x1ec   :  { %1392 = vrot.lane.b32.xlu0 %v1703_v18, %s1536_s12  ;;  %1362 = vrot.lane.b32.xlu2 %v1715_v27, %s1536_s12 }
 0x1f1   :  { %v392_v33 = vpop.f32.mrf.mxu1 }
 0x1f2   :  { %687 = vmatpush.msra.mxu2 %v392_v33  ;;  %1255 = vmatpush.msra.mxu3 %v392_v33  ;;  %v1406_v34 = vpack.i.bf16 %v389_v32, %v392_v33 }
 0x1f4   :  { %1372 = vrot.lane.b32.xlu2 %v1336_v31, %s1537_s13  ;;  %1407 = vrot.lane.b32.xlu0 %v1406_v34, %s1537_s13 }
 0x1f5   :  { %1342 = vrot.lane.b32.xlu1 %v1406_v34, %s1535_s2  ;;  %688 = vmatpush.msra.mxu2 %v389_v32 }
 0x1f6   :  { %1256 = vmatpush.msra.mxu3 %v389_v32 }
 0x1f7   :  { %689 = vmatpush.msra.mxu2 %v386_v30 }
 0x1f8   :  { %1257 = vmatpush.msra.mxu3 %v386_v30 }
 0x1f9   :  { %690 = vmatpush.msra.mxu2 %v383_v28 }
 0x1fa   :  { %1258 = vmatpush.msra.mxu3 %v383_v28 }
 0x1fb   :  { %691 = vmatpush.msra.mxu2 %v380_v26 }
 0x1fc   :  { %1259 = vmatpush.msra.mxu3 %v380_v26  ;;  %1412 = vrot.lane.b32.xlu0 %v1411_v35, %s1536_s12 }
 0x1fd   :  { %1382 = vrot.lane.b32.xlu2 %v1406_v34, %s1536_s12  ;;  %1347 = vrot.lane.b32.xlu1 %v1411_v35, %s1535_s2 }
 0x1fe   :  { %692 = vmatpush.msra.mxu2 %v377_v25  ;;  %1260 = vmatpush.msra.mxu3 %v377_v25 }
 0x200   :  { %693 = vmatpush.msra.mxu2 %v374_v23  ;;  %1261 = vmatpush.msra.mxu3 %v374_v23 }
 0x202   :  { %694 = vmatpush.msra.mxu2 %v371_v22  ;;  %1262 = vmatpush.msra.mxu3 %v371_v22 }
 0x204   :  { %695 = vmatpush.msra.mxu2 %v368_v20  ;;  %1263 = vmatpush.msra.mxu3 %v368_v20 }
 0x205   :  { %1427 = vrot.lane.b32.xlu0 %v1721_v29, %s1536_s12  ;;  %1387 = vrot.lane.b32.xlu2 %v1715_v27, %s1537_s13 }
 0x206   :  { %1357 = vrot.lane.b32.xlu1 %v1336_v31, %s1536_s12  ;;  %696 = vmatpush.msra.mxu2 %v365_v19 }
 0x207   :  { %1264 = vmatpush.msra.mxu3 %v365_v19 }
 0x208   :  { %697 = vmatpush.msra.mxu2 %v362_v17 }
 0x209   :  { %1265 = vmatpush.msra.mxu3 %v362_v17 }
 0x20a   :  { %698 = vmatpush.msra.mxu2 %v1700_v16 }
 0x20b   :  { %1266 = vmatpush.msra.mxu3 %v1700_v16 }
 0x20c   :  { %699 = vmatpush.msra.mxu2 %v1698_v15 }
 0x20d   :  { %1267 = vmatpush.msra.mxu3 %v1698_v15  ;;  %1447 = vrot.lane.b32.xlu0 %v1707_v21, %s1538_s14 }
 0x20e   :  { %1402 = vrot.lane.b32.xlu2 %v1711_v24, %s1537_s13  ;;  %1367 = vrot.lane.b32.xlu1 %v1711_v24, %s1536_s12  ;;  %v1770_v38 = vpop.permute.xlu2 %1322 }
 0x20f   :  { %700 = vmatpush.msra.mxu2 %v1696_v14  ;;  %1268 = vmatpush.msra.mxu3 %v1696_v14  ;;  %v1324_v25 = vunpack.i.l.bf16 %v1770_v38  ;;  %v1325_v28 = vunpack.i.h.bf16 %v1770_v38 }
 0x211   :  { %701 = vmatpush.msra.mxu2 %v1694_v13  ;;  %1269 = vmatpush.msra.mxu3 %v1694_v13 }
 0x213   :  { %702 = vmatpush.msra.mxu2 %v1692_v12  ;;  %1270 = vmatpush.msra.mxu3 %v1692_v12 }
 0x214   :  { %703 = vmatmul.f32.vlgmr.msra.gmra.mxu2 %v603_v36  ;;  %736 = vmatmul.f32.vlgmr.msra.gmra.mxu3 %v658_v42 }
 0x215   :  { %1462 = vrot.lane.b32.xlu0 %v1721_v29, %s1537_s13 }
 0x216   :  { %1422 = vrot.lane.b32.xlu2 %v1707_v21, %s1537_s13  ;;  %1397 = vrot.lane.b32.xlu1 %v1336_v31, %s1538_s14  ;;  %v1773_v40 = vpop.permute.xlu0 %1317  ;;  %v653_v31 = vld [vmem:[#allocation2 + $0x190] sm:$0xff] }
 0x217   :  { %v1319_v32 = vunpack.i.l.bf16 %v1773_v40 }
 0x21c   :  { %706 = vmatmul.f32.gmra.mxu2 %v608_v37  ;;  %739 = vmatmul.f32.gmra.mxu3 %v663_v46 }
 0x21e   :  { %1442 = vrot.lane.b32.xlu2 %v1703_v18, %s1537_s13  ;;  %1417 = vrot.lane.b32.xlu1 %v1715_v27, %s1538_s14 }
 0x224   :  { %709 = vmatmul.f32.gmra.mxu2 %v613_v39  ;;  %742 = vmatmul.f32.gmra.mxu3 %v668_v50 }
 0x226   :  { %1457 = vrot.lane.b32.xlu2 %v1703_v18, %s1538_s14  ;;  %1432 = vrot.lane.b32.xlu1 %v1406_v34, %s1538_s14  ;;  %v648_v18 = vld [vmem:[#allocation2 + $0x168] sm:$0xff] }
 0x22c   :  { %712 = vmatmul.f32.gmra.mxu2 %v618_v43  ;;  %745 = vmatmul.f32.gmra.mxu3 %v673_v55 }
 0x22e   :  { %1472 = vrot.lane.b32.xlu2 %v1721_v29, %s1538_s14  ;;  %1437 = vrot.lane.b32.xlu1 %v1711_v24, %s1538_s14 }
 0x234   :  { %715 = vmatmul.f32.gmra.mxu2 %v623_v47  ;;  %748 = vmatmul.f32.gmra.mxu3 %v678_v61  ;;  %v607_v61 = vld [vmem:[#allocation2 + $0x20] sm:$0xff] }
 0x236   :  { %1452 = vrot.lane.b32.xlu1 %v1411_v35, %s1537_s13  ;;  %v1328_v59 = vpop.permute.xlu1 %1327 }
 0x237   :  { %v1329_v19 = vunpack.i.l.bf16 %v1328_v59  ;;  %v1330_v21 = vunpack.i.h.bf16 %v1328_v59 }
 0x23c   :  { %718 = vmatmul.f32.gmra.mxu2 %v628_v51 }
 0x23e   :  { %1467 = vrot.lane.b32.xlu1 %v1411_v35, %s1538_s14  ;;  %v1338_v41 = vpop.permute.xlu2 %1337  ;;  %v1320_v35 = vunpack.i.h.bf16 %v1773_v40 }
 0x23f   :  { %v1339_v8 = vunpack.i.l.bf16 %v1338_v41  ;;  %v1340_v10 = vunpack.i.h.bf16 %v1338_v41 }
 0x244   :  { %721 = vmatmul.f32.gmra.mxu2 %v633_v57 }
 0x246   :  { %v1775_v44 = vpop.permute.xlu2 %1362  ;;  %v1333_v45 = vpop.permute.xlu0 %1332 }
 0x247   :  { %v1334_v14 = vunpack.i.l.bf16 %v1333_v45  ;;  %v1335_v16 = vunpack.i.h.bf16 %v1333_v45  ;;  %v1364_v33 = vunpack.i.l.bf16 %v1775_v44  ;;  %v1365_v36 = vunpack.i.h.bf16 %v1775_v44  ;;  %v604_v44 = vld [vmem:[#allocation2 + $0x8] sm:$0xff] }
 0x24c   :  { %724 = vmatmul.f32.gmra.mxu2 %v638_v62  ;;  %v614_v62 = vld [vmem:[#allocation2 + $0x58] sm:$0xff] }
 0x24e   :  { %v1777_v48 = vpop.permute.xlu2 %1372  ;;  %v1779_v49 = vpop.permute.xlu0 %1352 }
 0x24f   :  { %v1374_v6 = vunpack.i.l.bf16 %v1777_v48  ;;  %v1375_v9 = vunpack.i.h.bf16 %v1777_v48  ;;  %v1354_v40 = vunpack.i.l.bf16 %v1779_v49  ;;  %v1355_v46 = vunpack.i.h.bf16 %v1779_v49  ;;  %v642_v48 = vld [vmem:[#allocation2 + $0x138] sm:$0xff] }
 0x254   :  { %727 = vmatmul.f32.gmra.mxu2 %v643_v7 }
 0x256   :  { %v1781_v52 = vpop.permute.xlu0 %1377 }
 0x257   :  { %v1383_v53 = vpop.permute.xlu2 %1382  ;;  %v1379_v45 = vunpack.i.l.bf16 %v1781_v52  ;;  %v1380_v47 = vunpack.i.h.bf16 %v1781_v52 }
 0x258   :  { %v1384_v54 = vunpack.i.l.bf16 %v1383_v53  ;;  %v1385_v56 = vunpack.i.h.bf16 %v1383_v53 }
 0x25a   :  { %947 = vmatpush.msrb.mxu2 %v1384_v54 }
 0x25c   :  { %948 = vmatpush.msrb.mxu2 %v1385_v56  ;;  %v609_v56 = vld [vmem:[#allocation2 + $0x30] sm:$0xff] }
 0x25d   :  { %730 = vmatmul.f32.gmra.mxu2 %v648_v18 }
 0x25e   :  { %v1783_v58 = vpop.permute.xlu0 %1392 }
 0x25f   :  { %v1785_v60 = vpop.permute.xlu2 %1387  ;;  %v1394_v51 = vunpack.i.l.bf16 %v1783_v58  ;;  %v1395_v53 = vunpack.i.h.bf16 %v1783_v58 }
 0x260   :  { %v1389_v12 = vunpack.i.l.bf16 %v1785_v60  ;;  %v1390_v15 = vunpack.i.h.bf16 %v1785_v60  ;;  %v620_v60 = vld [vmem:[#allocation2 + $0x88] sm:$0xff] }
 0x265   :  { %733 = vmatmul.f32.gmra.mxu2 %v653_v31 }
 0x266   :  { %v1787_v63 = vpop.permute.xlu0 %1407 }
 0x267   :  { %v1343_v0 = vpop.permute.xlu1 %1342  ;;  %v1409_v1 = vunpack.i.l.bf16 %v1787_v63  ;;  %v1410_v4 = vunpack.i.h.bf16 %v1787_v63  ;;  %v615_v63 = vld [vmem:[#allocation2 + $0x60] sm:$0xff] }
 0x268   :  { %v1790_v2 = vpop.permute.xlu2 %1402  ;;  %v1344_v3 = vunpack.i.l.bf16 %v1343_v0  ;;  %v1345_v5 = vunpack.i.h.bf16 %v1343_v0 }
 0x269   :  { %882 = vmatpush.msrb.mxu1 %v1409_v1  ;;  %v1404_v17 = vunpack.i.l.bf16 %v1790_v2  ;;  %v1405_v20 = vunpack.i.h.bf16 %v1790_v2  ;;  %v647_v2 = vld [vmem:[#allocation2 + $0x160] sm:$0xff] }
 0x26a   :  { %752 = vmatpush.msrb.mxu3 %v1344_v3 }
 0x26b   :  { %883 = vmatpush.msrb.mxu1 %v1410_v4 }
 0x26c   :  { %753 = vmatpush.msrb.mxu3 %v1345_v5  ;;  %v612_v5 = vld [vmem:[#allocation2 + $0x48] sm:$0xff] }
 0x26d   :  { %884 = vmatpush.msrb.mxu1 %v1374_v6 }
 0x26e   :  { %754 = vmatpush.msrb.mxu3 %v1339_v8  ;;  %v1413_v43 = vpop.permute.xlu0 %1412 }
 0x26f   :  { %v1348_v11 = vpop.permute.xlu1 %1347  ;;  %885 = vmatpush.msrb.mxu1 %v1375_v9  ;;  %v1414_v54 = vunpack.i.l.bf16 %v1413_v43  ;;  %v1415_v57 = vunpack.i.h.bf16 %v1413_v43 }
 0x270   :  { %v1804_v13 = vpop.permute.xlu2 %1422  ;;  %755 = vmatpush.msrb.mxu3 %v1340_v10  ;;  %v1349_v38 = vunpack.i.l.bf16 %v1348_v11  ;;  %v1350_v41 = vunpack.i.h.bf16 %v1348_v11  ;;  %v619_v10 = vld [vmem:[#allocation2 + $0x80] sm:$0xff] }
 0x271   :  { %886 = vmatpush.msrb.mxu1 %v1389_v12  ;;  %v1424_v22 = vunpack.i.l.bf16 %v1804_v13  ;;  %v1425_v27 = vunpack.i.h.bf16 %v1804_v13  ;;  %v625_v13 = vld [vmem:[#allocation2 + $0xb0] sm:$0xff] }
 0x272   :  { %756 = vmatpush.msrb.mxu3 %v1334_v14 }
 0x273   :  { %887 = vmatpush.msrb.mxu1 %v1390_v15 }
 0x274   :  { %757 = vmatpush.msrb.mxu3 %v1335_v16 }
 0x275   :  { %888 = vmatpush.msrb.mxu1 %v1404_v17 }
 0x276   :  { %758 = vmatpush.msrb.mxu3 %v1329_v19  ;;  %v617_v19 = vld [vmem:[#allocation2 + $0x70] sm:$0xff] }
 0x277   :  { %889 = vmatpush.msrb.mxu1 %v1405_v20  ;;  %v1428_v55 = vpop.permute.xlu0 %1427 }
 0x278   :  { %v1818_v23 = vpop.permute.xlu2 %1442  ;;  %v1358_v24 = vpop.permute.xlu1 %1357  ;;  %759 = vmatpush.msrb.mxu3 %v1330_v21  ;;  %v1429_v59 = vunpack.i.l.bf16 %v1428_v55  ;;  %v1430_v52 = vunpack.i.h.bf16 %v1428_v55  ;;  %v634_v55 = vld [vmem:[#allocation2 + $0xf8] sm:$0xff] }
 0x279   :  { %890 = vmatpush.msrb.mxu1 %v1424_v22  ;;  %v1359_v26 = vunpack.i.l.bf16 %v1358_v24  ;;  %v1360_v29 = vunpack.i.h.bf16 %v1358_v24  ;;  %v1444_v30 = vunpack.i.l.bf16 %v1818_v23  ;;  %v1445_v34 = vunpack.i.h.bf16 %v1818_v23  ;;  %v652_v23 = vld [vmem:[#allocation2 + $0x188] sm:$0xff] }
 0x27a   :  { %760 = vmatpush.msrb.mxu3 %v1324_v25  ;;  %v624_v25 = vld [vmem:[#allocation2 + $0xa8] sm:$0xff] }
 0x27b   :  { %949 = vmatpush.msrb.mxu2 %v1359_v26  ;;  %891 = vmatpush.msrb.mxu1 %v1425_v27 }
 0x27c   :  { %761 = vmatpush.msrb.mxu3 %v1325_v28 }
 0x27d   :  { %950 = vmatpush.msrb.mxu2 %v1360_v29  ;;  %892 = vmatpush.msrb.mxu1 %v1444_v30 }
 0x27e   :  { %762 = vmatpush.msrb.mxu3 %v1319_v32 }
 0x27f   :  { %951 = vmatpush.msrb.mxu2 %v1364_v33  ;;  %893 = vmatpush.msrb.mxu1 %v1445_v34  ;;  %v1448_v14 = vpop.permute.xlu0 %1447 }
 0x280   :  { %v1368_v37 = vpop.permute.xlu1 %1367  ;;  %763 = vmatpush.msrb.mxu3 %v1320_v35  ;;  %v1458_v26 = vpop.permute.xlu2 %1457  ;;  %v1449_v29 = vunpack.i.l.bf16 %v1448_v14  ;;  %v1450_v33 = vunpack.i.h.bf16 %v1448_v14  ;;  %v622_v35 = vld [vmem:[#allocation2 + $0x98] sm:$0xff] }
 0x281   :  { %952 = vmatpush.msrb.mxu2 %v1365_v36  ;;  %v1369_v39 = vunpack.i.l.bf16 %v1368_v37  ;;  %v1370_v42 = vunpack.i.h.bf16 %v1368_v37  ;;  %v1459_v37 = vunpack.i.l.bf16 %v1458_v26  ;;  %v662_v14 = vld [vmem:[#allocation2 + $0x1d8] sm:$0xff] }
 0x282   :  { %764 = vmatpush.msrb.mxu3 %v1349_v38 }
 0x283   :  { %953 = vmatpush.msrb.mxu2 %v1369_v39  ;;  %v1460_v39 = vunpack.i.h.bf16 %v1458_v26  ;;  %v645_v26 = vld [vmem:[#allocation2 + $0x150] sm:$0xff] }
 0x284   :  { %765 = vmatpush.msrb.mxu3 %v1350_v41  ;;  %v629_v41 = vld [vmem:[#allocation2 + $0xd0] sm:$0xff] }
 0x285   :  { %954 = vmatpush.msrb.mxu2 %v1370_v42 }
 0x286   :  { %766 = vmatpush.msrb.mxu3 %v1354_v40  ;;  %v606_v40 = vld [vmem:[#allocation2 + $0x18] sm:$0xff] }
 0x287   :  { %955 = vmatpush.msrb.mxu2 %v1379_v45  ;;  %v1846_v32 = vpop.permute.xlu0 %1462 }
 0x288   :  { %v1398_v50 = vpop.permute.xlu1 %1397  ;;  %767 = vmatpush.msrb.mxu3 %v1355_v46  ;;  %v1464_v38 = vunpack.i.l.bf16 %v1846_v32  ;;  %v1465_v42 = vunpack.i.h.bf16 %v1846_v32  ;;  %v672_v32 = vld [vmem:[#allocation2 + $0x228] sm:$0xff] }
 0x289   :  { %956 = vmatpush.msrb.mxu2 %v1380_v47  ;;  %768 = vmatmul.f32.vlgmr.msrb.gmra.mxu3 %v604_v44  ;;  %v1399_v7 = vunpack.i.l.bf16 %v1398_v50  ;;  %v1400_v8 = vunpack.i.h.bf16 %v1398_v50  ;;  %v1473_v44 = vpop.permute.xlu2 %1472  ;;  %v627_v50 = vld [vmem:[#allocation2 + $0xc0] sm:$0xff] }
 0x28b   :  { %957 = vmatpush.msrb.mxu2 %v1394_v51  ;;  %v1474_v51 = vunpack.i.l.bf16 %v1473_v44 }
 0x28d   :  { %958 = vmatpush.msrb.mxu2 %v1395_v53  ;;  %v1475_v53 = vunpack.i.h.bf16 %v1473_v44 }
 0x28f   :  { %959 = vmatpush.msrb.mxu2 %v1414_v54  ;;  %v605_v54 = vld [vmem:[#allocation2 + $0x10] sm:$0xff] }
 0x290   :  { %v1418_v49 = vpop.permute.xlu1 %1417 }
 0x291   :  { %960 = vmatpush.msrb.mxu2 %v1415_v57  ;;  %771 = vmatmul.f32.gmra.mxu3 %v609_v56  ;;  %v1419_v16 = vunpack.i.l.bf16 %v1418_v49  ;;  %v1420_v18 = vunpack.i.h.bf16 %v1418_v49  ;;  %v611_v56 = vld [vmem:[#allocation2 + $0x40] sm:$0xff]  ;;  %v632_v49 = vld [vmem:[#allocation2 + $0xe8] sm:$0xff] }
 0x293   :  { %961 = vmatpush.msrb.mxu2 %v1429_v59  ;;  %v610_v59 = vld [vmem:[#allocation2 + $0x38] sm:$0xff] }
 0x295   :  { %962 = vmatpush.msrb.mxu2 %v1430_v52  ;;  %v639_v52 = vld [vmem:[#allocation2 + $0x120] sm:$0xff] }
 0x296   :  { %963 = vmatmul.f32.vlgmr.msrb.gmra.mxu2 %v607_v61  ;;  %v616_v61 = vld [vmem:[#allocation2 + $0x68] sm:$0xff] }
 0x297   :  { %v1857_v45 = vpop.f32.mrf.mxu2 }
 0x298   :  { %v1433_v0 = vpop.permute.xlu1 %1432 }
 0x299   :  { %774 = vmatmul.f32.gmra.mxu3 %v614_v62  ;;  %v1434_v3 = vunpack.i.l.bf16 %v1433_v0  ;;  %v1435_v58 = vunpack.i.h.bf16 %v1433_v0  ;;  %v637_v0 = vld [vmem:[#allocation2 + $0x110] sm:$0xff] }
 0x29b   :  { %817 = vmatpush.msrb.mxu0 %v1434_v3  ;;  %1271 = vmatpush.msra.mxu3 %v1434_v3  ;;  %v636_v3 = vld [vmem:[#allocation2 + $0x108] sm:$0xff] }
 0x29d   :  { %818 = vmatpush.msrb.mxu0 %v1435_v58  ;;  %1272 = vmatpush.msra.mxu3 %v1435_v58  ;;  %v657_v58 = vld [vmem:[#allocation2 + $0x1b0] sm:$0xff] }
 0x29e   :  { %966 = vmatmul.f32.gmra.mxu2 %v612_v5 }
 0x29f   :  { %819 = vmatpush.msrb.mxu0 %v1399_v7  ;;  %1273 = vmatpush.msra.mxu3 %v1399_v7  ;;  %v1861_v57 = vpop.f32.mrf.mxu2  ;;  %v635_v7 = vld [vmem:[#allocation2 + $0x100] sm:$0xff] }
 0x2a0   :  { %v1438_v11 = vpop.permute.xlu1 %1437 }
 0x2a1   :  { %820 = vmatpush.msrb.mxu0 %v1400_v8  ;;  %1274 = vmatpush.msra.mxu3 %v1400_v8  ;;  %v1439_v21 = vunpack.i.l.bf16 %v1438_v11  ;;  %v1440_v24 = vunpack.i.h.bf16 %v1438_v11  ;;  %v641_v11 = vld [vmem:[#allocation2 + $0x130] sm:$0xff] }
 0x2a2   :  { %777 = vmatmul.f32.gmra.mxu3 %v619_v10  ;;  %v664_v10 = vld [vmem:[#allocation2 + $0x1e8] sm:$0xff] }
 0x2a3   :  { %821 = vmatpush.msrb.mxu0 %v1419_v16  ;;  %1275 = vmatpush.msra.mxu3 %v1419_v16 }
 0x2a5   :  { %822 = vmatpush.msrb.mxu0 %v1420_v18  ;;  %1276 = vmatpush.msra.mxu3 %v1420_v18  ;;  %v640_v18 = vld [vmem:[#allocation2 + $0x128] sm:$0xff] }
 0x2a6   :  { %969 = vmatmul.f32.gmra.mxu2 %v617_v19  ;;  %v669_v19 = vld [vmem:[#allocation2 + $0x210] sm:$0xff] }
 0x2a7   :  { %823 = vmatpush.msrb.mxu0 %v1439_v21  ;;  %1277 = vmatpush.msra.mxu3 %v1439_v21  ;;  %v1869_v62 = vpop.f32.mrf.mxu2  ;;  %v646_v21 = vld [vmem:[#allocation2 + $0x158] sm:$0xff] }
 0x2a8   :  { %v1843_v28 = vpop.permute.xlu1 %1452 }
 0x2a9   :  { %824 = vmatpush.msrb.mxu0 %v1440_v24  ;;  %1278 = vmatpush.msra.mxu3 %v1440_v24  ;;  %v1454_v31 = vunpack.i.l.bf16 %v1843_v28  ;;  %v1455_v36 = vunpack.i.h.bf16 %v1843_v28  ;;  %v674_v28 = vld [vmem:[#allocation2 + $0x238] sm:$0xff] }
 0x2aa   :  { %780 = vmatmul.f32.gmra.mxu3 %v624_v25  ;;  %v667_v25 = vld [vmem:[#allocation2 + $0x200] sm:$0xff] }
 0x2ab   :  { %825 = vmatpush.msrb.mxu0 %v1449_v29  ;;  %1279 = vmatpush.msra.mxu3 %v1449_v29  ;;  %v651_v29 = vld [vmem:[#allocation2 + $0x180] sm:$0xff] }
 0x2ac   :  { %894 = vmatpush.msrb.mxu1 %v1454_v31 }
 0x2ad   :  { %826 = vmatpush.msrb.mxu0 %v1450_v33  ;;  %1280 = vmatpush.msra.mxu3 %v1450_v33 }
 0x2ae   :  { %895 = vmatpush.msrb.mxu1 %v1455_v36  ;;  %972 = vmatmul.f32.gmra.mxu2 %v622_v35  ;;  %v650_v35 = vld [vmem:[#allocation2 + $0x178] sm:$0xff] }
 0x2af   :  { %827 = vmatpush.msrb.mxu0 %v1459_v37  ;;  %1281 = vmatpush.msra.mxu3 %v1459_v37  ;;  %v656_v37 = vld [vmem:[#allocation2 + $0x1a8] sm:$0xff] }
 0x2b0   :  { %896 = vmatpush.msrb.mxu1 %v1464_v38  ;;  %v1468_v43 = vpop.permute.xlu1 %1467 }
 0x2b1   :  { %v1469_v46 = vunpack.i.l.bf16 %v1468_v43  ;;  %828 = vmatpush.msrb.mxu0 %v1460_v39  ;;  %1282 = vmatpush.msra.mxu3 %v1460_v39  ;;  %v1470_v47 = vunpack.i.h.bf16 %v1468_v43  ;;  %v677_v39 = vld [vmem:[#allocation2 + $0x250] sm:$0xff]  ;;  %v675_v43 = vld [vmem:[#allocation2 + $0x240] sm:$0xff] }
 0x2b2   :  { %897 = vmatpush.msrb.mxu1 %v1465_v42  ;;  %783 = vmatmul.f32.gmra.mxu3 %v629_v41 }
 0x2b3   :  { %898 = vmatmul.f32.vlgmr.msrb.gmra.mxu1 %v606_v40  ;;  %829 = vmatpush.msrb.mxu0 %v1469_v46  ;;  %v661_v40 = vld [vmem:[#allocation2 + $0x1d0] sm:$0xff] }
 0x2b4   :  { %1283 = vmatpush.msra.mxu3 %v1469_v46  ;;  %v682_v46 = vld [vmem:[#allocation2 + $0x278] sm:$0xff] }
 0x2b5   :  { %830 = vmatpush.msrb.mxu0 %v1470_v47 }
 0x2b6   :  { %1284 = vmatpush.msra.mxu3 %v1470_v47  ;;  %975 = vmatmul.f32.gmra.mxu2 %v627_v50  ;;  %v660_v47 = vld [vmem:[#allocation2 + $0x1c8] sm:$0xff] }
 0x2b7   :  { %831 = vmatpush.msrb.mxu0 %v1474_v51 }
 0x2b8   :  { %1285 = vmatpush.msra.mxu3 %v1474_v51  ;;  %v680_v51 = vld [vmem:[#allocation2 + $0x268] sm:$0xff] }
 0x2b9   :  { %832 = vmatpush.msrb.mxu0 %v1475_v53 }
 0x2ba   :  { %1286 = vmatpush.msra.mxu3 %v1475_v53  ;;  %833 = vmatmul.f32.vlgmr.msrb.gmra.mxu0 %v605_v54  ;;  %v666_v53 = vld [vmem:[#allocation2 + $0x1f8] sm:$0xff] }
 0x2bb   :  { %786 = vmatmul.f32.gmra.mxu3 %v634_v55  ;;  %901 = vmatmul.f32.gmra.mxu1 %v611_v56  ;;  %v665_v55 = vld [vmem:[#allocation2 + $0x1f0] sm:$0xff]  ;;  %v671_v56 = vld [vmem:[#allocation2 + $0x220] sm:$0xff] }
 0x2bc   :  { %1287 = vmatpush.msrb.mxu3 %v1409_v1  ;;  %v644_v1 = vld [vmem:[#allocation2 + $0x148] sm:$0xff] }
 0x2be   :  { %1288 = vmatpush.msrb.mxu3 %v1410_v4  ;;  %978 = vmatmul.f32.gmra.mxu2 %v632_v49  ;;  %v621_v4 = vld [vmem:[#allocation2 + $0x90] sm:$0xff] }
 0x2bf   :  { %v681_v49 = vld [vmem:[#allocation2 + $0x270] sm:$0xff] }
 0x2c0   :  { %1289 = vmatpush.msrb.mxu3 %v1374_v6  ;;  %v1879_v6 = vpop.f32.mrf.mxu2 }
 0x2c2   :  { %1290 = vmatpush.msrb.mxu3 %v1375_v9  ;;  %836 = vmatmul.f32.gmra.mxu0 %v610_v59  ;;  %v649_v9 = vld [vmem:[#allocation2 + $0x170] sm:$0xff] }
 0x2c3   :  { %789 = vmatmul.f32.gmra.mxu3 %v639_v52  ;;  %904 = vmatmul.f32.gmra.mxu1 %v616_v61  ;;  %v670_v61 = vld [vmem:[#allocation2 + $0x218] sm:$0xff] }
 0x2c4   :  { %1291 = vmatpush.msrb.mxu3 %v1389_v12  ;;  %v626_v12 = vld [vmem:[#allocation2 + $0xb8] sm:$0xff] }
 0x2c6   :  { %1292 = vmatpush.msrb.mxu3 %v1390_v15  ;;  %981 = vmatmul.f32.gmra.mxu2 %v637_v0  ;;  %v676_v0 = vld [vmem:[#allocation2 + $0x248] sm:$0xff] }
 0x2c8   :  { %1293 = vmatpush.msrb.mxu3 %v1404_v17  ;;  %v1891_v15 = vpop.f32.mrf.mxu2  ;;  %v654_v17 = vld [vmem:[#allocation2 + $0x198] sm:$0xff] }
 0x2ca   :  { %1294 = vmatpush.msrb.mxu3 %v1405_v20  ;;  %839 = vmatmul.f32.gmra.mxu0 %v615_v63  ;;  %v631_v20 = vld [vmem:[#allocation2 + $0xe0] sm:$0xff] }
 0x2cb   :  { %792 = vmatmul.f32.gmra.mxu3 %v644_v1  ;;  %907 = vmatmul.f32.gmra.mxu1 %v621_v4  ;;  %v1926_v1 = vld [vmem:[%s2101_s4] ss:$0 sm:$0xff] }
 0x2cc   :  { %1295 = vmatpush.msrb.mxu3 %v1424_v22  ;;  %v1901_v22 = vpop.f32.mrf.mxu3  ;;  %v714_v4 = vadd.f32 %v1926_v1, %v1879_v6 }
 0x2ce   :  { %1296 = vmatpush.msrb.mxu3 %v1425_v27  ;;  %984 = vmatmul.f32.gmra.mxu2 %v642_v48 }
 0x2d0   :  { %1297 = vmatpush.msrb.mxu3 %v1444_v30  ;;  %v1903_v27 = vpop.f32.mrf.mxu2  ;;  %v630_v30 = vld [vmem:[#allocation2 + $0xd8] sm:$0xff] }
 0x2d2   :  { %1298 = vmatpush.msrb.mxu3 %v1445_v34  ;;  %842 = vmatmul.f32.gmra.mxu0 %v620_v60  ;;  %v659_v34 = vld [vmem:[#allocation2 + $0x1c0] sm:$0xff] }
 0x2d3   :  { %795 = vmatmul.f32.gmra.mxu3 %v649_v9  ;;  %910 = vmatmul.f32.gmra.mxu1 %v626_v12  ;;  %v717_v12 = vadd.f32 %v1926_v1, %v1891_v15 }
 0x2d4   :  { %1299 = vmatpush.msrb.mxu3 %v1454_v31  ;;  %v1905_v5 = vpop.f32.mrf.mxu3 }
 0x2d6   :  { %1300 = vmatpush.msrb.mxu3 %v1455_v36  ;;  %987 = vmatmul.f32.gmra.mxu2 %v647_v2  ;;  %v679_v36 = vld [vmem:[#allocation2 + $0x260] sm:$0xff] }
 0x2d8   :  { %1301 = vmatpush.msrb.mxu3 %v1464_v38  ;;  %v1907_v8 = vpop.f32.mrf.mxu2 }
 0x2da   :  { %1302 = vmatpush.msrb.mxu3 %v1465_v42  ;;  %845 = vmatmul.f32.gmra.mxu0 %v625_v13  ;;  %v655_v42 = vld [vmem:[#allocation2 + $0x1a0] sm:$0xff] }
 0x2db   :  { %798 = vmatmul.f32.gmra.mxu3 %v654_v17  ;;  %913 = vmatmul.f32.gmra.mxu1 %v631_v20 }
 0x2dc   :  { %v1909_v16 = vpop.f32.mrf.mxu3 }
 0x2de   :  { %990 = vmatmul.f32.gmra.mxu2 %v652_v23  ;;  %v705_v23 = vadd.f32 %v1926_v1, %v1857_v45  ;;  %v723_v45 = vadd.f32 %v1926_v1, %v1907_v8 }
 0x2e0   :  { %v1911_v24 = vpop.f32.mrf.mxu2 }
 0x2e1   :  { %v726_v8 = vadd.f32 %v1926_v1, %v1911_v24 }
 0x2e2   :  { %848 = vmatmul.f32.gmra.mxu0 %v630_v30  ;;  %v720_v30 = vadd.f32 %v1926_v1, %v1903_v27 }
 0x2e3   :  { %801 = vmatmul.f32.gmra.mxu3 %v659_v34  ;;  %916 = vmatmul.f32.gmra.mxu1 %v636_v3 }
 0x2e4   :  { %v1913_v31 = vpop.f32.mrf.mxu3 }
 0x2e6   :  { %993 = vmatmul.f32.gmra.mxu2 %v657_v58 }
 0x2e8   :  { %v1915_v33 = vpop.f32.mrf.mxu2 }
 0x2ea   :  { %851 = vmatmul.f32.gmra.mxu0 %v635_v7 }
 0x2eb   :  { %804 = vmatmul.f32.gmra.mxu3 %v664_v10  ;;  %919 = vmatmul.f32.gmra.mxu1 %v641_v11 }
 0x2ec   :  { %v1917_v38 = vpop.f32.mrf.mxu3 }
 0x2ee   :  { %996 = vmatmul.f32.gmra.mxu2 %v662_v14  ;;  %v708_v14 = vadd.f32 %v1926_v1, %v1861_v57  ;;  %v711_v57 = vadd.f32 %v1926_v1, %v1869_v62 }
 0x2f0   :  { %v1919_v41 = vpop.f32.mrf.mxu2 }
 0x2f2   :  { %854 = vmatmul.f32.gmra.mxu0 %v640_v18 }
 0x2f3   :  { %807 = vmatmul.f32.gmra.mxu3 %v669_v19  ;;  %922 = vmatmul.f32.gmra.mxu1 %v646_v21 }
 0x2f6   :  { %999 = vmatmul.f32.gmra.mxu2 %v667_v25 }
 0x2f8   :  { %v1921_v50 = vpop.f32.mrf.mxu2 }
 0x2fa   :  { %857 = vmatmul.f32.gmra.mxu0 %v645_v26 }
 0x2fb   :  { %810 = vmatmul.f32.gmra.mxu3 %v674_v28  ;;  %925 = vmatmul.f32.gmra.mxu1 %v651_v29 }
 0x2fe   :  { %1002 = vmatmul.f32.gmra.mxu2 %v672_v32 }
 0x302   :  { %860 = vmatmul.f32.gmra.mxu0 %v650_v35 }
 0x303   :  { %813 = vmatmul.f32.gmra.mxu3 %v679_v36  ;;  %928 = vmatmul.f32.gmra.mxu1 %v656_v37  ;;  %v1028_v36 = vld [vmem:[%s2102_s5] sm:$0xff] }
 0x306   :  { %1005 = vmatmul.f32.gmra.mxu2 %v677_v39  ;;  %v1029_v39 = vld [vmem:[%s2102_s5 + $0x8] sm:$0xff] }
 0x30a   :  { %863 = vmatmul.f32.gmra.mxu0 %v655_v42 }
 0x30b   :  { %875 = vmatmul.f32.vlgmr.msra.gmra.mxu3 %v675_v43  ;;  %931 = vmatmul.f32.gmra.mxu1 %v661_v40 }
 0x30c   :  { %v769_v44 = vpop.f32.mrf.mxu3 }
 0x30d   :  { %v770_v3 = vadd.f32 %v769_v44, %v705_v23 }
 0x30e   :  { %1008 = vmatmul.f32.gmra.mxu2 %v682_v46 }
 0x312   :  { %866 = vmatmul.f32.gmra.mxu0 %v660_v47 }
 0x313   :  { %878 = vmatmul.f32.gmra.mxu3 %v680_v51  ;;  %934 = vmatmul.f32.gmra.mxu1 %v666_v53 }
 0x314   :  { %v772_v54 = vpop.f32.mrf.mxu3 }
 0x315   :  { %v773_v19 = vadd.f32 %v772_v54, %v708_v14 }
 0x319   :  { %v964_v59 = vpop.f32.mrf.mxu2 }
 0x31a   :  { %869 = vmatmul.f32.gmra.mxu0 %v665_v55 }
 0x31b   :  { %937 = vmatmul.f32.gmra.mxu1 %v671_v56  ;;  %943 = vmatmul.f32.vlgmr.msrb.gmra.mxu3 %v681_v49 }
 0x31c   :  { %v775_v52 = vpop.f32.mrf.mxu3 }
 0x31d   :  { %v776_v42 = vadd.f32 %v775_v52, %v711_v57  ;;  %v729_v52 = vadd.f32 %v1926_v1, %v1915_v33  ;;  %v1031_v33 = vld [vmem:[%s2102_s5 + $0x18] sm:$0xff] }
 0x321   :  { %v967_v63 = vpop.f32.mrf.mxu2 }
 0x322   :  { %872 = vmatmul.f32.gmra.mxu0 %v670_v61 }
 0x323   :  { %940 = vmatmul.f32.gmra.mxu1 %v676_v0 }
 0x325   :  { %v778_v48 = vpop.f32.mrf.mxu3 }
 0x326   :  { %v779_v60 = vadd.f32 %v778_v48, %v714_v4 }
 0x329   :  { %v970_v9 = vpop.f32.mrf.mxu2 }
 0x32d   :  { %v781_v2 = vpop.f32.mrf.mxu3 }
 0x32e   :  { %v1932_v13 = vadd.f32 %v781_v2, %v717_v12 }
 0x330   :  { %v899_v17 = vpop.f32.mrf.mxu1 }
 0x331   :  { %v973_v20 = vpop.f32.mrf.mxu2 }
 0x335   :  { %v784_v34 = vpop.f32.mrf.mxu3 }
 0x336   :  { %v1938_v6 = vadd.f32 %v784_v34, %v720_v30  ;;  %v1030_v30 = vld [vmem:[%s2102_s5 + $0x10] sm:$0xff] }
 0x337   :  { %v834_v58 = vpop.f32.mrf.mxu0 }
 0x338   :  { %v835_v7 = vadd.f32 %v834_v58, %v770_v3  ;;  %v902_v10 = vpop.f32.mrf.mxu1 }
 0x339   :  { %v1940_v11 = vpop.f32.mrf.mxu2 }
 0x33a   :  { %v900_v15 = vadd.f32 %v899_v17, %v835_v7 }
 0x33c   :  { %v965_v18 = vadd.f32 %v964_v59, %v900_v15 }
 0x33e   :  { %v787_v21 = vpop.f32.mrf.mxu3  ;;  %v1012_v32 = vmax.f32 %v965_v18, 0.0 }
 0x33f   :  { %v1946_v27 = vadd.f32 %v787_v21, %v723_v45  ;;  %v837_v25 = vpop.f32.mrf.mxu0 }
 0x340   :  { %v838_v26 = vadd.f32 %v837_v25, %v773_v19  ;;  %v905_v28 = vpop.f32.mrf.mxu1  ;;  %v1044_v43 = vadd.f32 %v1028_v36, %v1012_v32 }
 0x341   :  { %v1948_v29 = vpop.f32.mrf.mxu2 }
 0x342   :  { %v903_v35 = vadd.f32 %v902_v10, %v838_v26  ;;  %v1061_v55 = vsel %vm1060_vm1, %v1044_v43, -inf }
 0x344   :  { %v968_v37 = vadd.f32 %v967_v63, %v903_v35 }
 0x346   :  { %v1013_v40 = vmax.f32 %v968_v37, 0.0  ;;  %v790_v46 = vpop.f32.mrf.mxu3 }
 0x347   :  { %v1960_v44 = vadd.f32 %v790_v46, %v726_v8  ;;  %v840_v47 = vpop.f32.mrf.mxu0 }
 0x348   :  { %v1045_v51 = vadd.f32 %v1029_v39, %v1013_v40  ;;  %v841_v53 = vadd.f32 %v840_v47, %v776_v42  ;;  %v908_v54 = vpop.f32.mrf.mxu1 }
 0x349   :  { %v1962_v62 = vpop.f32.mrf.mxu2 }
 0x34a   :  { %v1062_v24 = vsel %vm1060_vm1, %v1045_v51, -inf  ;;  %v906_v56 = vadd.f32 %v905_v28, %v841_v53 }
 0x34b   :  { %v1063_v49 = vmax.f32 %v1061_v55, %v1062_v24 }
 0x34c   :  { %v971_v59 = vadd.f32 %v970_v9, %v906_v56  ;;  %v732_v9 = vadd.f32 %v1926_v1, %v1919_v41 }
 0x34d   :  { %v1064_v23 = vrot.slane %v1063_v49, 4 }
 0x34e   :  { %v793_v61 = vpop.f32.mrf.mxu3  ;;  %v1014_v2 = vmax.f32 %v971_v59, 0.0 }
 0x34f   :  { %v1968_v0 = vadd.f32 %v793_v61, %v729_v52  ;;  %v843_v63 = vpop.f32.mrf.mxu0  ;;  %v1065_v7 = vmax.f32 %v1063_v49, %v1064_v23 }
 0x350   :  { %v844_v4 = vadd.f32 %v843_v63, %v779_v60  ;;  %v911_v48 = vpop.f32.mrf.mxu1  ;;  %v1046_v3 = vadd.f32 %v1030_v30, %v1014_v2 }
 0x351   :  { %v1970_v12 = vpop.f32.mrf.mxu2  ;;  %v1066_v25 = vrot.slane %v1065_v7, 2 }
 0x352   :  { %v909_v17 = vadd.f32 %v908_v54, %v844_v4  ;;  %v1033_v54 = vld [vmem:[%s2102_s5 + $0x28] sm:$0xff] }
 0x353   :  { %v1067_v36 = vmax.f32 %v1065_v7, %v1066_v25 }
 0x354   :  { %v974_v34 = vadd.f32 %v973_v20, %v909_v17  ;;  %v1070_v20 = vsel %vm1060_vm1, %v1046_v3, -inf }
 0x355   :  { %v1068_v46 = vrot.slane %v1067_v36, 1 }
 0x356   :  { %v1015_v60 = vmax.f32 %v974_v34, 0.0  ;;  %v796_v58 = vpop.f32.mrf.mxu3 }
 0x357   :  { %v1980_v10 = vadd.f32 %v796_v58, %v732_v9  ;;  %v846_v15 = vpop.f32.mrf.mxu0  ;;  %v1069_v56 = vmax.f32 %v1067_v36, %v1068_v46 }
 0x358   :  { %v1047_v14 = vadd.f32 %v1031_v33, %v1015_v60  ;;  %v847_v18 = vadd.f32 %v846_v15, %v1932_v13  ;;  %v914_v45 = vpop.f32.mrf.mxu1 }
 0x359   :  { %v1983_v19 = vpop.f32.mrf.mxu2 }
 0x35a   :  { %v1071_v41 = vsel %vm1060_vm1, %v1047_v14, -inf  ;;  %v912_v21 = vadd.f32 %v911_v48, %v847_v18  ;;  %v1034_v18 = vld [vmem:[%s2102_s5 + $0x30] sm:$0xff] }
 0x35b   :  { %v1072_v26 = vmax.f32 %v1070_v20, %v1071_v41  ;;  %v1035_v20 = vld [vmem:[%s2102_s5 + $0x38] sm:$0xff] }
 0x35c   :  { %v977_v28 = vadd.f32 %v1940_v11, %v912_v21  ;;  %v1032_v11 = vld [vmem:[%s2102_s5 + $0x20] sm:$0xff] }
 0x35d   :  { %v1073_v32 = vrot.slane %v1072_v26, 4 }
 0x35e   :  { %v1988_v35 = vpop.f32.mrf.mxu3  ;;  %v1016_v42 = vmax.f32 %v977_v28, 0.0 }
 0x35f   :  { %v1074_v57 = vmax.f32 %v1072_v26, %v1073_v32  ;;  %v849_v37 = vpop.f32.mrf.mxu0 }
 0x360   :  { %v850_v13 = vadd.f32 %v849_v37, %v1938_v6  ;;  %v917_v8 = vpop.f32.mrf.mxu1  ;;  %v1048_v6 = vadd.f32 %v1032_v11, %v1016_v42 }
 0x361   :  { %v1075_v39 = vrot.slane %v1074_v57, 2  ;;  %v1991_v40 = vpop.f32.mrf.mxu2 }
 0x362   :  { %v915_v43 = vadd.f32 %v914_v45, %v850_v13 }
 0x363   :  { %v1076_v47 = vmax.f32 %v1074_v57, %v1075_v39 }
 0x364   :  { %v980_v51 = vadd.f32 %v1948_v29, %v915_v43  ;;  %v1079_v29 = vsel %vm1060_vm1, %v1048_v6, -inf }
 0x365   :  { %v1077_v53 = vrot.slane %v1076_v47, 1 }
 0x366   :  { %v1017_v55 = vmax.f32 %v980_v51, 0.0  ;;  %v2000_v24 = vpop.f32.mrf.mxu3 }
 0x367   :  { %v1078_v49 = vmax.f32 %v1076_v47, %v1077_v53  ;;  %v852_v59 = vpop.f32.mrf.mxu0 }
 0x368   :  { %v1049_v52 = vadd.f32 %v1033_v54, %v1017_v55  ;;  %v853_v61 = vadd.f32 %v852_v59, %v1946_v27  ;;  %v920_v63 = vpop.f32.mrf.mxu1 }
 0x369   :  { %v1148_v4 = vsel %vm1147_vm2, %v1078_v49, %v1069_v56  ;;  %v2006_v30 = vpop.f32.mrf.mxu2  ;;  %v1036_v49 = vld [vmem:[%s2102_s5 + $0x40] sm:$0xff] }
 0x36a   :  { %v1080_v48 = vsel %vm1060_vm1, %v1049_v52, -inf  ;;  %v918_v2 = vadd.f32 %v917_v8, %v853_v61 }
 0x36b   :  { %v1081_v17 = vmax.f32 %v1079_v29, %v1080_v48 }
 0x36c   :  { %v983_v23 = vadd.f32 %v1962_v62, %v918_v2 }
 0x36d   :  { %v1082_v34 = vrot.slane %v1081_v17, 4 }
 0x36e   :  { %v2008_v9 = vpop.f32.mrf.mxu3  ;;  %v1018_v7 = vmax.f32 %v983_v23, 0.0 }
 0x36f   :  { %v1083_v33 = vmax.f32 %v1081_v17, %v1082_v34  ;;  %v855_v3 = vpop.f32.mrf.mxu0 }
 0x370   :  { %v856_v60 = vadd.f32 %v855_v3, %v1960_v44  ;;  %v923_v27 = vpop.f32.mrf.mxu1  ;;  %v1050_v41 = vadd.f32 %v1034_v18, %v1018_v7 }
 0x371   :  { %v1084_v58 = vrot.slane %v1083_v33, 2  ;;  %v997_v44 = vpop.f32.mrf.mxu2 }
 0x372   :  { %v921_v15 = vadd.f32 %v920_v63, %v856_v60 }
 0x373   :  { %v1085_v14 = vmax.f32 %v1083_v33, %v1084_v58 }
 0x374   :  { %v986_v62 = vadd.f32 %v1970_v12, %v921_v15  ;;  %v1088_v12 = vsel %vm1060_vm1, %v1050_v41, -inf }
 0x375   :  { %v1086_v45 = vrot.slane %v1085_v14, 1 }
 0x376   :  { %v1019_v21 = vmax.f32 %v986_v62, 0.0  ;;  %v2018_v25 = vpop.f32.mrf.mxu3 }
 0x377   :  { %v1087_v26 = vmax.f32 %v1085_v14, %v1086_v45  ;;  %v858_v28 = vpop.f32.mrf.mxu0 }
 0x378   :  { %v1051_v32 = vadd.f32 %v1035_v20, %v1019_v21  ;;  %v859_v36 = vadd.f32 %v858_v28, %v1968_v0  ;;  %v926_v57 = vpop.f32.mrf.mxu1  ;;  %v741_v28 = vadd.f32 %v1926_v1, %v1905_v5  ;;  %v1134_v5 = vld [vmem:[%s2103_s6 + $0x8] sm:$0xf] }
 0x379   :  { %v1150_v37 = vsel %vm1149_vm3, %v1087_v26, %v1148_v4  ;;  %v2027_v54 = vpop.f32.mrf.mxu2  ;;  %1253 = vmatpush.msk.msra.mxu3 %vm1163_vm5, %v1134_v5 }
 0x37a   :  { %v1089_v13 = vsel %vm1060_vm1, %v1051_v32, -inf  ;;  %v924_v8 = vadd.f32 %v923_v27, %v859_v36 }
 0x37b   :  { %v1090_v39 = vmax.f32 %v1088_v12, %v1089_v13 }
 0x37c   :  { %v989_v43 = vadd.f32 %v1983_v19, %v924_v8  ;;  %v735_v19 = vadd.f32 %v1926_v1, %v1921_v50 }
 0x37d   :  { %v1091_v42 = vrot.slane %v1090_v39, 4 }
 0x37e   :  { %v2024_v46 = vpop.f32.mrf.mxu3  ;;  %v1020_v6 = vmax.f32 %v989_v43, 0.0  ;;  %v800_v61 = vadd.f32 %v1988_v35, %v735_v19  ;;  %v738_v35 = vadd.f32 %v1926_v1, %v1901_v22  ;;  %v1038_v22 = vld [vmem:[%s2102_s5 + $0x50] sm:$0xff]  ;;  %v744_v19 = vadd.f32 %v1926_v1, %v1909_v16 }
 0x37f   :  { %v1092_v47 = vmax.f32 %v1090_v39, %v1091_v42  ;;  %v861_v11 = vpop.f32.mrf.mxu0 }
 0x380   :  { %v862_v51 = vadd.f32 %v861_v11, %v1980_v10  ;;  %v929_v53 = vpop.f32.mrf.mxu1  ;;  %v1037_v10 = vld [vmem:[%s2102_s5 + $0x48] sm:$0xff]  ;;  %v1052_v63 = vadd.f32 %v1036_v49, %v1020_v6  ;;  %v803_v7 = vadd.f32 %v2000_v24, %v738_v35  ;;  %v750_v11 = vadd.f32 %v1926_v1, %v1917_v38  ;;  %v1042_v35 = vld [vmem:[%s2102_s5 + $0x70] sm:$0xff] }
 0x381   :  { %v1093_v0 = vrot.slane %v1092_v47, 2  ;;  %v2041_v60 = vpop.f32.mrf.mxu2  ;;  %v809_v38 = vadd.f32 %v2018_v25, %v744_v19 }
 0x382   :  { %v927_v55 = vadd.f32 %v926_v57, %v862_v51  ;;  %v1097_v50 = vsel %vm1060_vm1, %v1052_v63, -inf }
 0x383   :  { %v1094_v56 = vmax.f32 %v1092_v47, %v1093_v0 }
 0x384   :  { %v992_v59 = vadd.f32 %v1991_v40, %v927_v55  ;;  %v747_v55 = vadd.f32 %v1926_v1, %v1913_v31 }
 0x385   :  { %v1095_v52 = vrot.slane %v1094_v56, 1 }
 0x386   :  { %v1021_v4 = vmax.f32 %v992_v59, 0.0  ;;  %v814_v29 = vpop.f32.mrf.mxu3  ;;  %v812_v59 = vadd.f32 %v2024_v46, %v747_v55  ;;  %v1043_v46 = vld [vmem:[%s2102_s5 + $0x78] sm:$0xff] }
 0x387   :  { %v1096_v48 = vmax.f32 %v1094_v56, %v1095_v52  ;;  %v864_v2 = vpop.f32.mrf.mxu0  ;;  %v815_v56 = vadd.f32 %v814_v29, %v750_v11  ;;  %v1477_v11 = vld [vmem:[%s2104_s7] ss:$0 sm:$0xff] }
 0x388   :  { %v1053_v17 = vadd.f32 %v1037_v10, %v1021_v4  ;;  %v865_v23 = vadd.f32 %v864_v2, %v800_v61  ;;  %v932_v34 = vpop.f32.mrf.mxu1 }
 0x389   :  { %v1152_v33 = vsel %vm1151_vm4, %v1096_v48, %v1150_v37  ;;  %v1006_v24 = vpop.f32.mrf.mxu2  ;;  %v1039_v37 = vld [vmem:[%s2102_s5 + $0x58] sm:$0xff] }
 0x38a   :  { %v1098_v40 = vsel %vm1060_vm1, %v1053_v17, -inf  ;;  %v930_v3 = vadd.f32 %v929_v53, %v865_v23 }
 0x38b   :  { %v1099_v27 = vmax.f32 %v1097_v50, %v1098_v40 }
 0x38c   :  { %v995_v15 = vadd.f32 %v2006_v30, %v930_v3  ;;  %v806_v30 = vadd.f32 %v2008_v9, %v741_v28 }
 0x38d   :  { %v1100_v58 = vrot.slane %v1099_v27, 4 }
 0x38e   :  { %v876_v14 = vpop.f32.mrf.mxu3  ;;  %v1022_v21 = vmax.f32 %v995_v15, 0.0 }
 0x38f   :  { %v1101_v18 = vmax.f32 %v1099_v27, %v1100_v58  ;;  %v867_v62 = vpop.f32.mrf.mxu0  ;;  %v877_v48 = vadd.f32 %v876_v14, %v812_v59 }
 0x390   :  { %v868_v45 = vadd.f32 %v867_v62, %v803_v7  ;;  %v935_v20 = vpop.f32.mrf.mxu1  ;;  %v1054_v12 = vadd.f32 %v1038_v22, %v1022_v21  ;;  %v1041_v7 = vld [vmem:[%s2102_s5 + $0x68] sm:$0xff] }
 0x391   :  { %v1102_v41 = vrot.slane %v1101_v18, 2  ;;  %v1009_v4 = vpop.f32.mrf.mxu2 }
 0x392   :  { %v933_v26 = vadd.f32 %v932_v34, %v868_v45  ;;  %v1106_v53 = vsel %vm1060_vm1, %v1054_v12, -inf }
 0x393   :  { %v1103_v32 = vmax.f32 %v1101_v18, %v1102_v41 }
 0x394   :  { %v998_v36 = vadd.f32 %v997_v44, %v933_v26  ;;  %v1133_v44 = vld [vmem:[%s2103_s6] sm:$0xff] }
 0x395   :  { %v1104_v57 = vrot.slane %v1103_v32, 1  ;;  %1182 = vmatpush.msra.mxu3 %v1133_v44 }
 0x396   :  { %v1023_v13 = vmax.f32 %v998_v36, 0.0  ;;  %v879_v8 = vpop.f32.mrf.mxu3 }
 0x397   :  { %v1105_v39 = vmax.f32 %v1103_v32, %v1104_v57  ;;  %v870_v9 = vpop.f32.mrf.mxu0  ;;  %v880_v10 = vadd.f32 %v879_v8, %v815_v56 }
 0x398   :  { %v1055_v42 = vadd.f32 %v1039_v37, %v1023_v13  ;;  %v871_v43 = vadd.f32 %v870_v9, %v806_v30  ;;  %v938_v47 = vpop.f32.mrf.mxu1 }
 0x399   :  { %v1154_v51 = vsel %vm1153_vm6, %v1105_v39, %v1152_v33 }
 0x39a   :  { %v1107_v0 = vsel %vm1060_vm1, %v1055_v42, -inf  ;;  %v936_v6 = vadd.f32 %v935_v20, %v871_v43 }
 0x39b   :  { %v1108_v49 = vmax.f32 %v1106_v53, %v1107_v0 }
 0x39c   :  { %v1001_v61 = vadd.f32 %v2027_v54, %v936_v6  ;;  %v1040_v54 = vld [vmem:[%s2102_s5 + $0x60] sm:$0xff] }
 0x39d   :  { %v1109_v52 = vrot.slane %v1108_v49, 4 }
 0x39e   :  { %v944_v63 = vpop.f32.mrf.mxu3  ;;  %v1024_v16 = vmax.f32 %v1001_v61, 0.0 }
 0x39f   :  { %v1110_v2 = vmax.f32 %v1108_v49, %v1109_v52  ;;  %v945_v17 = vadd.f32 %v944_v63, %v880_v10  ;;  %v873_v23 = vpop.f32.mrf.mxu0 }
 0x3a0   :  { %v874_v31 = vadd.f32 %v873_v23, %v809_v38  ;;  %v941_v29 = vpop.f32.mrf.mxu1  ;;  %v1056_v18 = vadd.f32 %v1040_v54, %v1024_v16 }
 0x3a1   :  { %v1111_v34 = vrot.slane %v1110_v2, 2  ;;  %v942_v33 = vadd.f32 %v941_v29, %v877_v48  ;;  %v1010_v50 = vadd.f32 %v1009_v4, %v945_v17 }
 0x3a2   :  { %v939_v1 = vadd.f32 %v938_v47, %v874_v31  ;;  %v1115_v28 = vsel %vm1060_vm1, %v1056_v18, -inf }
 0x3a3   :  { %v1112_v25 = vmax.f32 %v1110_v2, %v1111_v34  ;;  %v1007_v40 = vadd.f32 %v1006_v24, %v942_v33  ;;  %v1027_v3 = vmax.f32 %v1010_v50, 0.0 }
 0x3a4   :  { %v1004_v27 = vadd.f32 %v2041_v60, %v939_v1 }
 0x3a5   :  { %v1113_v58 = vrot.slane %v1112_v25, 1  ;;  %v1026_v15 = vmax.f32 %v1007_v40, 0.0  ;;  %v1059_v14 = vadd.f32 %v1043_v46, %v1027_v3 }
 0x3a6   :  { %v1025_v62 = vmax.f32 %v1004_v27, 0.0 }
 0x3a7   :  { %v1114_v45 = vmax.f32 %v1112_v25, %v1113_v58  ;;  %v1058_v20 = vadd.f32 %v1042_v35, %v1026_v15  ;;  %v1125_v60 = vsel %vm1060_vm1, %v1059_v14, -inf }
 0x3a8   :  { %v1057_v41 = vadd.f32 %v1041_v7, %v1025_v62 }
 0x3a9   :  { %v1124_v21 = vsel %vm1060_vm1, %v1058_v20, -inf  ;;  %v1156_v26 = vsel %vm1155_vm7, %v1114_v45, %v1154_v51 }
 0x3aa   :  { %v1116_v32 = vsel %vm1060_vm1, %v1057_v41, -inf  ;;  %v1126_v22 = vmax.f32 %v1124_v21, %v1125_v60 }
 0x3ab   :  { %v1117_v36 = vmax.f32 %v1115_v28, %v1116_v32 }
 0x3ac   :  { %v1127_v24 = vrot.slane %v1126_v22, 4 }
 0x3ad   :  { %v1118_v30 = vrot.slane %v1117_v36, 4 }
 0x3ae   :  { %v1128_v57 = vmax.f32 %v1126_v22, %v1127_v24 }
 0x3af   :  { %v1119_v37 = vmax.f32 %v1117_v36, %v1118_v30 }
 0x3b0   :  { %v1129_v12 = vrot.slane %v1128_v57, 2 }
 0x3b1   :  { %v1120_v13 = vrot.slane %v1119_v37, 2 }
 0x3b2   :  { %v1130_v8 = vmax.f32 %v1128_v57, %v1129_v12 }
 0x3b3   :  { %v1121_v5 = vmax.f32 %v1119_v37, %v1120_v13 }
 0x3b4   :  { %v1131_v44 = vrot.slane %v1130_v8, 1 }
 0x3b5   :  { %v1122_v39 = vrot.slane %v1121_v5, 1 }
 0x3b6   :  { %v1132_v42 = vmax.f32 %v1130_v8, %v1131_v44 }
 0x3b7   :  { %v1123_v9 = vmax.f32 %v1121_v5, %v1122_v39 }
 0x3b9   :  { %v1158_v43 = vsel %vm1157_vm8, %v1123_v9, %v1156_v26 }
 0x3ba   :  { %v1160_v47 = vsel %vm1159_vm9, %v1132_v42, %v1158_v43 }
 0x3bb   :  { %1254 = vmatmul.msk.f32.vlgmr.msra.gmra.mxu3 %vm1060_vm1, %v1160_v47 }
 0x43e   :  { %v1184_v51 = vpop.f32.mrf.mxu3 }
 0x43f   :  { %v1185_v53 = vadd.f32 %v1477_v11, %v1184_v51 }
 0x441   :  { %1187 = vst [vmem:[#allocation5] sm:$0xff] %v1185_v53 }
 0x442   :  { %1198 = dma.vmem_to_hbm [thread:$0]  %s1194_s25, 128, %s1196_s0, [#allocation4]  }
 0x443   :  { %1528 = dma.done.wait [#allocation4], 128  }
 0x444   :  { %1529 = vsyncadd [#allocation4], 4294967168 }
 0x445   :  { %1203 = vsyncpa [#allocation3], 1 }
 0x446   :  { %1204 = vsyncpa [#allocation4], 1 }

</bundles_post_ra>
